<compile_context>
chip_gen: v7x
topology: tpu7x:2x2x1
jax: 0.10.0
libtpu: 0.0.40
codegen_flags: <defaults>
</compile_context>

<pallas_src>
import math

import jax
import jax.numpy as jnp
from jax.experimental import pallas as pl
from jax.experimental.pallas import tpu as pltpu


def _round_up(x, m):
    return (x + m - 1) // m * m


def _make_equalized_conv2d_kernel(TN, Cin, H, W, Cout, KH, KW, pad, stride,
                                  Hp, Wp, Wo1, Ho_out, FLi, MG, scale):
    """Build the kernel with all shape parameters closed over (static)."""
    K = Cin * KH * KW

    def kernel(x_ref, w_ref, b_ref, o_ref, xflat, p_scr):
        # x_ref : (TN, Cin, H, W)          raw NCHW input tile (TN images)
        # w_ref : (Cout, K)                unscaled weights, k-order = (kh, kw, ci)
        # b_ref : (Cout, 1)                bias column (broadcasts over the lane dim)
        # o_ref : (TN, Cout, Ho_out*Wo1)   lane-dense output slab
        # xflat : (Cin, MG + slack)        zero-padded images, flattened row-major
        # p_scr : (K, MG)                  im2col matrix (shifted windows of xflat)

        # 1) Zero the flat buffer: this realises the conv zero-padding (and the
        #    tail slack) without any jnp.pad / HBM pass in the wrapper.
        xflat[...] = jnp.zeros_like(xflat)

        # 2) Scatter the NCHW input rows into the flat padded layout.
        for n in range(TN):
            base = n * FLi + pad * Wp + pad
            for h in range(H):
                xflat[:, pl.ds(base + h * Wp, W)] = x_ref[n, :, h, :]

        # 3) im2col: each kernel tap (kh, kw) is one *contiguous* shifted window
        #    of the flat buffer; row block [t*Cin, (t+1)*Cin) of P holds tap t.
        for kh in range(KH):
            for kw in range(KW):
                t = kh * KW + kw
                p_scr[pl.ds(t * Cin, Cin), :] = xflat[:, pl.ds(kh * Wp + kw, MG)]

        # 4) Single K = Cin*KH*KW GEMM with a lane-dense (Cout, MG) accumulator.
        #    He scale applied in-kernel; f32 accumulation on the MXU.
        w2 = w_ref[...] * scale                                   # (Cout, K)
        res = jnp.dot(w2, p_scr[...], preferred_element_type=jnp.float32)
        res = res + b_ref[...]                                    # (Cout, MG)

        # 5) Keep only the valid columns (the flat layout carries KW-1 junk
        #    columns per image row) and, for stride>1, only the strided rows.
        for n in range(TN):
            for ho in range(Ho_out):
                c0 = n * FLi + (ho * stride) * Wp
                o_ref[n, :, pl.ds(ho * Wo1, Wo1)] = (
                    res[:, c0:c0 + Wo1].astype(o_ref.dtype))

    return kernel


def equalized_conv2d(x, weight, bias, stride=1, padding=0):
    """Forward pass of EqualizedConv2d (conv2d with runtime He-scaled weights + bias).

    x      : (N, Cin, H, W)      float32, NCHW (PyTorch convention)
    weight : (Cout, Cin, KH, KW) float32, OIHW (unscaled, as stored by the module)
    bias   : (Cout,)             float32
    """
    N, Cin, H, W = x.shape
    Cout, _, KH, KW = weight.shape
    s, p = int(stride), int(padding)

    Hp, Wp = H + 2 * p, W + 2 * p
    Wo1 = Wp - KW + 1                              # stride-1 output width
    Ho_out = (Hp - KH) // s + 1                    # output rows actually produced
    Wo_out = (Wp - KW) // s + 1

    fan_in = Cin * KH * KW
    scale = math.sqrt(2.0) / math.sqrt(fan_in)

    # Batch tiling: pack as many images as practical into one grid step
    # (amortizes the ~0.35us/step pipeline overhead); axis is "parallel".
    if N <= 8:
        TN = N
    else:
        TN = max(d for d in range(1, 9) if N % d == 0)
    GN = N // TN

    FLi = Hp * Wp                                  # flat length of one padded image
    MG = _round_up(TN * FLi, 128)                  # lane-dense GEMM M dimension
    FLT = MG + (KH - 1) * Wp + (KW - 1)            # flat buffer incl. tap-shift slack
    K = Cin * KH * KW

    # Tiny parameter-side glue (weight is ~KB): reorder OIHW -> (Cout, kh, kw, ci)
    # so the im2col k-order matches.  The He scale stays in-kernel.
    w2 = weight.transpose(0, 2, 3, 1).reshape(Cout, K)
    b2 = bias.reshape(Cout, 1)

    kernel = _make_equalized_conv2d_kernel(
        TN, Cin, H, W, Cout, KH, KW, p, s, Hp, Wp, Wo1, Ho_out, FLi, MG, scale)

    out_flat = pl.pallas_call(
        kernel,
        out_shape=jax.ShapeDtypeStruct((N, Cout, Ho_out * Wo1), x.dtype),
        grid_spec=pltpu.PrefetchScalarGridSpec(
            num_scalar_prefetch=0,
            grid=(GN,),
            in_specs=[
                pl.BlockSpec((TN, Cin, H, W), lambda g: (g, 0, 0, 0)),
                pl.BlockSpec((Cout, K), lambda g: (0, 0)),
                pl.BlockSpec((Cout, 1), lambda g: (0, 0)),
            ],
            out_specs=pl.BlockSpec((TN, Cout, Ho_out * Wo1), lambda g: (g, 0, 0)),
            scratch_shapes=[
                pltpu.VMEM((Cin, FLT), jnp.float32),   # flat zero-padded images
                pltpu.VMEM((K, MG), jnp.float32),      # im2col matrix
            ],
        ),
        compiler_params=pltpu.CompilerParams(dimension_semantics=("parallel",)),
    )(x, w2, b2)

    out = out_flat.reshape(N, Cout, Ho_out, Wo1)   # free reshape -> NCHW
    if s > 1:
        # TODO(synk): stride>1 already skips non-strided rows in-kernel, but all
        # stride-1 columns are still computed and subsampled here; a fully
        # strided in-kernel gather would also avoid the width-wise extra work.
        out = out[..., ::s]
    return out


if __name__ == "__main__":
    key = jax.random.PRNGKey(0)
    k_x, k_w = jax.random.split(key)

    # Module config: EqualizedConv2d(in_channels=4, out_channels=8, kernel_size=3,
    #                                stride=1, padding=1)
    N, Cin, H, W = 2, 4, 16, 16
    Cout, KH, KW = 8, 3, 3
    stride, padding = 1, 1

    x = jax.random.normal(k_x, (N, Cin, H, W), dtype=jnp.float32)
    weight = jax.random.normal(k_w, (Cout, Cin, KH, KW), dtype=jnp.float32)
    bias = jnp.zeros((Cout,), dtype=jnp.float32)

    out = equalized_conv2d(x, weight, bias, stride=stride, padding=padding)
    out = jax.block_until_ready(out)

    # Pure-JAX reference (same semantics as torch.nn.functional.conv2d).
    scale = math.sqrt(2.0) / math.sqrt(KH * KW * Cin)
    ref = jax.lax.conv_general_dilated(
        x, weight * scale,
        window_strides=(stride, stride),
        padding=((padding, padding), (padding, padding)),
        dimension_numbers=("NCHW", "OIHW", "NCHW"),
    ) + bias.reshape(1, -1, 1, 1)

    assert out.shape == ref.shape, (out.shape, ref.shape)
    assert jnp.allclose(out, ref, atol=5e-4, rtol=5e-4), float(jnp.max(jnp.abs(out - ref)))
    print("KERNEL_OK")
</pallas_src>

<mosaic_0001>
module attributes {stable_mosaic.version = 11 : i64} {
  func.func @kernel(%arg0: i32, %arg1: memref<2x4x16x16xf32, #tpu.memory_space<vmem>>, %arg2: memref<8x36xf32, #tpu.memory_space<vmem>>, %arg3: memref<8x1xf32, #tpu.memory_space<vmem>>, %arg4: memref<2x8x256xf32, #tpu.memory_space<vmem>>, %arg5: memref<4x806xf32, #tpu.memory_space<vmem>>, %arg6: memref<36x768xf32, #tpu.memory_space<vmem>>) attributes {dimension_semantics = [#tpu.dimension_semantics<parallel>], iteration_bounds = array<i64: 1>, scalar_prefetch = 0 : i64, scratch_operands = 2 : i64, tpu.core_type = #tpu.core_type<tc>, window_params = [{transform_indices = @transform_0, window_bounds = array<i64: 2, 4, 16, 16>}, {pipeline_mode = #tpu.pipeline_mode<synchronous>, transform_indices = @transform_1, window_bounds = array<i64: 8, 36>}, {pipeline_mode = #tpu.pipeline_mode<synchronous>, transform_indices = @transform_2, window_bounds = array<i64: 8, 1>}, {transform_indices = @transform_3, window_bounds = array<i64: 2, 8, 256>}]} {
    %cst = arith.constant 0.000000e+00 : f32
    %0 = vector.broadcast %cst : f32 to vector<4x806xf32>
    %c0 = arith.constant 0 : index
    %c0_0 = arith.constant 0 : index
    %1 = vector.load %arg5[%c0, %c0_0] : memref<4x806xf32, #tpu.memory_space<vmem>>, vector<4x806xf32>
    tpu.vector_store %arg5[%c0, %c0_0], %0 {strides = array<i32>} : memref<4x806xf32, #tpu.memory_space<vmem>>, vector<4x806xf32>,
    %c0_1 = arith.constant 0 : index
    %c0_2 = arith.constant 0 : index
    %c0_3 = arith.constant 0 : index
    %c0_4 = arith.constant 0 : index
    %2 = vector.load %arg1[%c0_1, %c0_2, %c0_3, %c0_4] : memref<2x4x16x16xf32, #tpu.memory_space<vmem>>, vector<1x4x1x16xf32>
    %3 = vector.shape_cast %2 : vector<1x4x1x16xf32> to vector<4x16xf32>
    %c0_5 = arith.constant 0 : index
    %c19 = arith.constant 19 : index
    %4 = vector.load %arg5[%c0_5, %c19] : memref<4x806xf32, #tpu.memory_space<vmem>>, vector<4x16xf32>
    tpu.vector_store %arg5[%c0_5, %c19], %3 {strides = array<i32>} : memref<4x806xf32, #tpu.memory_space<vmem>>, vector<4x16xf32>,
    %c0_6 = arith.constant 0 : index
    %c0_7 = arith.constant 0 : index
    %c1 = arith.constant 1 : index
    %c0_8 = arith.constant 0 : index
    %5 = vector.load %arg1[%c0_6, %c0_7, %c1, %c0_8] : memref<2x4x16x16xf32, #tpu.memory_space<vmem>>, vector<1x4x1x16xf32>
    %6 = vector.shape_cast %5 : vector<1x4x1x16xf32> to vector<4x16xf32>
    %c0_9 = arith.constant 0 : index
    %c37 = arith.constant 37 : index
    %7 = vector.load %arg5[%c0_9, %c37] : memref<4x806xf32, #tpu.memory_space<vmem>>, vector<4x16xf32>
    tpu.vector_store %arg5[%c0_9, %c37], %6 {strides = array<i32>} : memref<4x806xf32, #tpu.memory_space<vmem>>, vector<4x16xf32>,
    %c0_10 = arith.constant 0 : index
    %c0_11 = arith.constant 0 : index
    %c2 = arith.constant 2 : index
    %c0_12 = arith.constant 0 : index
    %8 = vector.load %arg1[%c0_10, %c0_11, %c2, %c0_12] : memref<2x4x16x16xf32, #tpu.memory_space<vmem>>, vector<1x4x1x16xf32>
    %9 = vector.shape_cast %8 : vector<1x4x1x16xf32> to vector<4x16xf32>
    %c0_13 = arith.constant 0 : index
    %c55 = arith.constant 55 : index
    %10 = vector.load %arg5[%c0_13, %c55] : memref<4x806xf32, #tpu.memory_space<vmem>>, vector<4x16xf32>
    tpu.vector_store %arg5[%c0_13, %c55], %9 {strides = array<i32>} : memref<4x806xf32, #tpu.memory_space<vmem>>, vector<4x16xf32>,
    %c0_14 = arith.constant 0 : index
    %c0_15 = arith.constant 0 : index
    %c3 = arith.constant 3 : index
    %c0_16 = arith.constant 0 : index
    %11 = vector.load %arg1[%c0_14, %c0_15, %c3, %c0_16] : memref<2x4x16x16xf32, #tpu.memory_space<vmem>>, vector<1x4x1x16xf32>
    %12 = vector.shape_cast %11 : vector<1x4x1x16xf32> to vector<4x16xf32>
    %c0_17 = arith.constant 0 : index
    %c73 = arith.constant 73 : index
    %13 = vector.load %arg5[%c0_17, %c73] : memref<4x806xf32, #tpu.memory_space<vmem>>, vector<4x16xf32>
    tpu.vector_store %arg5[%c0_17, %c73], %12 {strides = array<i32>} : memref<4x806xf32, #tpu.memory_space<vmem>>, vector<4x16xf32>,
    %c0_18 = arith.constant 0 : index
    %c0_19 = arith.constant 0 : index
    %c4 = arith.constant 4 : index
    %c0_20 = arith.constant 0 : index
    %14 = vector.load %arg1[%c0_18, %c0_19, %c4, %c0_20] : memref<2x4x16x16xf32, #tpu.memory_space<vmem>>, vector<1x4x1x16xf32>
    %15 = vector.shape_cast %14 : vector<1x4x1x16xf32> to vector<4x16xf32>
    %c0_21 = arith.constant 0 : index
    %c91 = arith.constant 91 : index
    %16 = vector.load %arg5[%c0_21, %c91] : memref<4x806xf32, #tpu.memory_space<vmem>>, vector<4x16xf32>
    tpu.vector_store %arg5[%c0_21, %c91], %15 {strides = array<i32>} : memref<4x806xf32, #tpu.memory_space<vmem>>, vector<4x16xf32>,
    %c0_22 = arith.constant 0 : index
    %c0_23 = arith.constant 0 : index
    %c5 = arith.constant 5 : index
    %c0_24 = arith.constant 0 : index
    %17 = vector.load %arg1[%c0_22, %c0_23, %c5, %c0_24] : memref<2x4x16x16xf32, #tpu.memory_space<vmem>>, vector<1x4x1x16xf32>
    %18 = vector.shape_cast %17 : vector<1x4x1x16xf32> to vector<4x16xf32>
    %c0_25 = arith.constant 0 : index
    %c109 = arith.constant 109 : index
    %19 = vector.load %arg5[%c0_25, %c109] : memref<4x806xf32, #tpu.memory_space<vmem>>, vector<4x16xf32>
    tpu.vector_store %arg5[%c0_25, %c109], %18 {strides = array<i32>} : memref<4x806xf32, #tpu.memory_space<vmem>>, vector<4x16xf32>,
    %c0_26 = arith.constant 0 : index
    %c0_27 = arith.constant 0 : index
    %c6 = arith.constant 6 : index
    %c0_28 = arith.constant 0 : index
    %20 = vector.load %arg1[%c0_26, %c0_27, %c6, %c0_28] : memref<2x4x16x16xf32, #tpu.memory_space<vmem>>, vector<1x4x1x16xf32>
    %21 = vector.shape_cast %20 : vector<1x4x1x16xf32> to vector<4x16xf32>
    %c0_29 = arith.constant 0 : index
    %c127 = arith.constant 127 : index
    %22 = vector.load %arg5[%c0_29, %c127] : memref<4x806xf32, #tpu.memory_space<vmem>>, vector<4x16xf32>
    tpu.vector_store %arg5[%c0_29, %c127], %21 {strides = array<i32>} : memref<4x806xf32, #tpu.memory_space<vmem>>, vector<4x16xf32>,
    %c0_30 = arith.constant 0 : index
    %c0_31 = arith.constant 0 : index
    %c7 = arith.constant 7 : index
    %c0_32 = arith.constant 0 : index
    %23 = vector.load %arg1[%c0_30, %c0_31, %c7, %c0_32] : memref<2x4x16x16xf32, #tpu.memory_space<vmem>>, vector<1x4x1x16xf32>
    %24 = vector.shape_cast %23 : vector<1x4x1x16xf32> to vector<4x16xf32>
    %c0_33 = arith.constant 0 : index
    %c145 = arith.constant 145 : index
    %25 = vector.load %arg5[%c0_33, %c145] : memref<4x806xf32, #tpu.memory_space<vmem>>, vector<4x16xf32>
    tpu.vector_store %arg5[%c0_33, %c145], %24 {strides = array<i32>} : memref<4x806xf32, #tpu.memory_space<vmem>>, vector<4x16xf32>,
    %c0_34 = arith.constant 0 : index
    %c0_35 = arith.constant 0 : index
    %c8 = arith.constant 8 : index
    %c0_36 = arith.constant 0 : index
    %26 = vector.load %arg1[%c0_34, %c0_35, %c8, %c0_36] : memref<2x4x16x16xf32, #tpu.memory_space<vmem>>, vector<1x4x1x16xf32>
    %27 = vector.shape_cast %26 : vector<1x4x1x16xf32> to vector<4x16xf32>
    %c0_37 = arith.constant 0 : index
    %c163 = arith.constant 163 : index
    %28 = vector.load %arg5[%c0_37, %c163] : memref<4x806xf32, #tpu.memory_space<vmem>>, vector<4x16xf32>
    tpu.vector_store %arg5[%c0_37, %c163], %27 {strides = array<i32>} : memref<4x806xf32, #tpu.memory_space<vmem>>, vector<4x16xf32>,
    %c0_38 = arith.constant 0 : index
    %c0_39 = arith.constant 0 : index
    %c9 = arith.constant 9 : index
    %c0_40 = arith.constant 0 : index
    %29 = vector.load %arg1[%c0_38, %c0_39, %c9, %c0_40] : memref<2x4x16x16xf32, #tpu.memory_space<vmem>>, vector<1x4x1x16xf32>
    %30 = vector.shape_cast %29 : vector<1x4x1x16xf32> to vector<4x16xf32>
    %c0_41 = arith.constant 0 : index
    %c181 = arith.constant 181 : index
    %31 = vector.load %arg5[%c0_41, %c181] : memref<4x806xf32, #tpu.memory_space<vmem>>, vector<4x16xf32>
    tpu.vector_store %arg5[%c0_41, %c181], %30 {strides = array<i32>} : memref<4x806xf32, #tpu.memory_space<vmem>>, vector<4x16xf32>,
    %c0_42 = arith.constant 0 : index
    %c0_43 = arith.constant 0 : index
    %c10 = arith.constant 10 : index
    %c0_44 = arith.constant 0 : index
    %32 = vector.load %arg1[%c0_42, %c0_43, %c10, %c0_44] : memref<2x4x16x16xf32, #tpu.memory_space<vmem>>, vector<1x4x1x16xf32>
    %33 = vector.shape_cast %32 : vector<1x4x1x16xf32> to vector<4x16xf32>
    %c0_45 = arith.constant 0 : index
    %c199 = arith.constant 199 : index
    %34 = vector.load %arg5[%c0_45, %c199] : memref<4x806xf32, #tpu.memory_space<vmem>>, vector<4x16xf32>
    tpu.vector_store %arg5[%c0_45, %c199], %33 {strides = array<i32>} : memref<4x806xf32, #tpu.memory_space<vmem>>, vector<4x16xf32>,
    %c0_46 = arith.constant 0 : index
    %c0_47 = arith.constant 0 : index
    %c11 = arith.constant 11 : index
    %c0_48 = arith.constant 0 : index
    %35 = vector.load %arg1[%c0_46, %c0_47, %c11, %c0_48] : memref<2x4x16x16xf32, #tpu.memory_space<vmem>>, vector<1x4x1x16xf32>
    %36 = vector.shape_cast %35 : vector<1x4x1x16xf32> to vector<4x16xf32>
    %c0_49 = arith.constant 0 : index
    %c217 = arith.constant 217 : index
    %37 = vector.load %arg5[%c0_49, %c217] : memref<4x806xf32, #tpu.memory_space<vmem>>, vector<4x16xf32>
    tpu.vector_store %arg5[%c0_49, %c217], %36 {strides = array<i32>} : memref<4x806xf32, #tpu.memory_space<vmem>>, vector<4x16xf32>,
    %c0_50 = arith.constant 0 : index
    %c0_51 = arith.constant 0 : index
    %c12 = arith.constant 12 : index
    %c0_52 = arith.constant 0 : index
    %38 = vector.load %arg1[%c0_50, %c0_51, %c12, %c0_52] : memref<2x4x16x16xf32, #tpu.memory_space<vmem>>, vector<1x4x1x16xf32>
    %39 = vector.shape_cast %38 : vector<1x4x1x16xf32> to vector<4x16xf32>
    %c0_53 = arith.constant 0 : index
    %c235 = arith.constant 235 : index
    %40 = vector.load %arg5[%c0_53, %c235] : memref<4x806xf32, #tpu.memory_space<vmem>>, vector<4x16xf32>
    tpu.vector_store %arg5[%c0_53, %c235], %39 {strides = array<i32>} : memref<4x806xf32, #tpu.memory_space<vmem>>, vector<4x16xf32>,
    %c0_54 = arith.constant 0 : index
    %c0_55 = arith.constant 0 : index
    %c13 = arith.constant 13 : index
    %c0_56 = arith.constant 0 : index
    %41 = vector.load %arg1[%c0_54, %c0_55, %c13, %c0_56] : memref<2x4x16x16xf32, #tpu.memory_space<vmem>>, vector<1x4x1x16xf32>
    %42 = vector.shape_cast %41 : vector<1x4x1x16xf32> to vector<4x16xf32>
    %c0_57 = arith.constant 0 : index
    %c253 = arith.constant 253 : index
    %43 = vector.load %arg5[%c0_57, %c253] : memref<4x806xf32, #tpu.memory_space<vmem>>, vector<4x16xf32>
    tpu.vector_store %arg5[%c0_57, %c253], %42 {strides = array<i32>} : memref<4x806xf32, #tpu.memory_space<vmem>>, vector<4x16xf32>,
    %c0_58 = arith.constant 0 : index
    %c0_59 = arith.constant 0 : index
    %c14 = arith.constant 14 : index
    %c0_60 = arith.constant 0 : index
    %44 = vector.load %arg1[%c0_58, %c0_59, %c14, %c0_60] : memref<2x4x16x16xf32, #tpu.memory_space<vmem>>, vector<1x4x1x16xf32>
    %45 = vector.shape_cast %44 : vector<1x4x1x16xf32> to vector<4x16xf32>
    %c0_61 = arith.constant 0 : index
    %c271 = arith.constant 271 : index
    %46 = vector.load %arg5[%c0_61, %c271] : memref<4x806xf32, #tpu.memory_space<vmem>>, vector<4x16xf32>
    tpu.vector_store %arg5[%c0_61, %c271], %45 {strides = array<i32>} : memref<4x806xf32, #tpu.memory_space<vmem>>, vector<4x16xf32>,
    %c0_62 = arith.constant 0 : index
    %c0_63 = arith.constant 0 : index
    %c15 = arith.constant 15 : index
    %c0_64 = arith.constant 0 : index
    %47 = vector.load %arg1[%c0_62, %c0_63, %c15, %c0_64] : memref<2x4x16x16xf32, #tpu.memory_space<vmem>>, vector<1x4x1x16xf32>
    %48 = vector.shape_cast %47 : vector<1x4x1x16xf32> to vector<4x16xf32>
    %c0_65 = arith.constant 0 : index
    %c289 = arith.constant 289 : index
    %49 = vector.load %arg5[%c0_65, %c289] : memref<4x806xf32, #tpu.memory_space<vmem>>, vector<4x16xf32>
    tpu.vector_store %arg5[%c0_65, %c289], %48 {strides = array<i32>} : memref<4x806xf32, #tpu.memory_space<vmem>>, vector<4x16xf32>,
    %c1_66 = arith.constant 1 : index
    %c0_67 = arith.constant 0 : index
    %c0_68 = arith.constant 0 : index
    %c0_69 = arith.constant 0 : index
    %50 = vector.load %arg1[%c1_66, %c0_67, %c0_68, %c0_69] : memref<2x4x16x16xf32, #tpu.memory_space<vmem>>, vector<1x4x1x16xf32>
    %51 = vector.shape_cast %50 : vector<1x4x1x16xf32> to vector<4x16xf32>
    %c0_70 = arith.constant 0 : index
    %c343 = arith.constant 343 : index
    %52 = vector.load %arg5[%c0_70, %c343] : memref<4x806xf32, #tpu.memory_space<vmem>>, vector<4x16xf32>
    tpu.vector_store %arg5[%c0_70, %c343], %51 {strides = array<i32>} : memref<4x806xf32, #tpu.memory_space<vmem>>, vector<4x16xf32>,
    %c1_71 = arith.constant 1 : index
    %c0_72 = arith.constant 0 : index
    %c1_73 = arith.constant 1 : index
    %c0_74 = arith.constant 0 : index
    %53 = vector.load %arg1[%c1_71, %c0_72, %c1_73, %c0_74] : memref<2x4x16x16xf32, #tpu.memory_space<vmem>>, vector<1x4x1x16xf32>
    %54 = vector.shape_cast %53 : vector<1x4x1x16xf32> to vector<4x16xf32>
    %c0_75 = arith.constant 0 : index
    %c361 = arith.constant 361 : index
    %55 = vector.load %arg5[%c0_75, %c361] : memref<4x806xf32, #tpu.memory_space<vmem>>, vector<4x16xf32>
    tpu.vector_store %arg5[%c0_75, %c361], %54 {strides = array<i32>} : memref<4x806xf32, #tpu.memory_space<vmem>>, vector<4x16xf32>,
    %c1_76 = arith.constant 1 : index
    %c0_77 = arith.constant 0 : index
    %c2_78 = arith.constant 2 : index
    %c0_79 = arith.constant 0 : index
    %56 = vector.load %arg1[%c1_76, %c0_77, %c2_78, %c0_79] : memref<2x4x16x16xf32, #tpu.memory_space<vmem>>, vector<1x4x1x16xf32>
    %57 = vector.shape_cast %56 : vector<1x4x1x16xf32> to vector<4x16xf32>
    %c0_80 = arith.constant 0 : index
    %c379 = arith.constant 379 : index
    %58 = vector.load %arg5[%c0_80, %c379] : memref<4x806xf32, #tpu.memory_space<vmem>>, vector<4x16xf32>
    tpu.vector_store %arg5[%c0_80, %c379], %57 {strides = array<i32>} : memref<4x806xf32, #tpu.memory_space<vmem>>, vector<4x16xf32>,
    %c1_81 = arith.constant 1 : index
    %c0_82 = arith.constant 0 : index
    %c3_83 = arith.constant 3 : index
    %c0_84 = arith.constant 0 : index
    %59 = vector.load %arg1[%c1_81, %c0_82, %c3_83, %c0_84] : memref<2x4x16x16xf32, #tpu.memory_space<vmem>>, vector<1x4x1x16xf32>
    %60 = vector.shape_cast %59 : vector<1x4x1x16xf32> to vector<4x16xf32>
    %c0_85 = arith.constant 0 : index
    %c397 = arith.constant 397 : index
    %61 = vector.load %arg5[%c0_85, %c397] : memref<4x806xf32, #tpu.memory_space<vmem>>, vector<4x16xf32>
    tpu.vector_store %arg5[%c0_85, %c397], %60 {strides = array<i32>} : memref<4x806xf32, #tpu.memory_space<vmem>>, vector<4x16xf32>,
    %c1_86 = arith.constant 1 : index
    %c0_87 = arith.constant 0 : index
    %c4_88 = arith.constant 4 : index
    %c0_89 = arith.constant 0 : index
    %62 = vector.load %arg1[%c1_86, %c0_87, %c4_88, %c0_89] : memref<2x4x16x16xf32, #tpu.memory_space<vmem>>, vector<1x4x1x16xf32>
    %63 = vector.shape_cast %62 : vector<1x4x1x16xf32> to vector<4x16xf32>
    %c0_90 = arith.constant 0 : index
    %c415 = arith.constant 415 : index
    %64 = vector.load %arg5[%c0_90, %c415] : memref<4x806xf32, #tpu.memory_space<vmem>>, vector<4x16xf32>
    tpu.vector_store %arg5[%c0_90, %c415], %63 {strides = array<i32>} : memref<4x806xf32, #tpu.memory_space<vmem>>, vector<4x16xf32>,
    %c1_91 = arith.constant 1 : index
    %c0_92 = arith.constant 0 : index
    %c5_93 = arith.constant 5 : index
    %c0_94 = arith.constant 0 : index
    %65 = vector.load %arg1[%c1_91, %c0_92, %c5_93, %c0_94] : memref<2x4x16x16xf32, #tpu.memory_space<vmem>>, vector<1x4x1x16xf32>
    %66 = vector.shape_cast %65 : vector<1x4x1x16xf32> to vector<4x16xf32>
    %c0_95 = arith.constant 0 : index
    %c433 = arith.constant 433 : index
    %67 = vector.load %arg5[%c0_95, %c433] : memref<4x806xf32, #tpu.memory_space<vmem>>, vector<4x16xf32>
    tpu.vector_store %arg5[%c0_95, %c433], %66 {strides = array<i32>} : memref<4x806xf32, #tpu.memory_space<vmem>>, vector<4x16xf32>,
    %c1_96 = arith.constant 1 : index
    %c0_97 = arith.constant 0 : index
    %c6_98 = arith.constant 6 : index
    %c0_99 = arith.constant 0 : index
    %68 = vector.load %arg1[%c1_96, %c0_97, %c6_98, %c0_99] : memref<2x4x16x16xf32, #tpu.memory_space<vmem>>, vector<1x4x1x16xf32>
    %69 = vector.shape_cast %68 : vector<1x4x1x16xf32> to vector<4x16xf32>
    %c0_100 = arith.constant 0 : index
    %c451 = arith.constant 451 : index
    %70 = vector.load %arg5[%c0_100, %c451] : memref<4x806xf32, #tpu.memory_space<vmem>>, vector<4x16xf32>
    tpu.vector_store %arg5[%c0_100, %c451], %69 {strides = array<i32>} : memref<4x806xf32, #tpu.memory_space<vmem>>, vector<4x16xf32>,
    %c1_101 = arith.constant 1 : index
    %c0_102 = arith.constant 0 : index
    %c7_103 = arith.constant 7 : index
    %c0_104 = arith.constant 0 : index
    %71 = vector.load %arg1[%c1_101, %c0_102, %c7_103, %c0_104] : memref<2x4x16x16xf32, #tpu.memory_space<vmem>>, vector<1x4x1x16xf32>
    %72 = vector.shape_cast %71 : vector<1x4x1x16xf32> to vector<4x16xf32>
    %c0_105 = arith.constant 0 : index
    %c469 = arith.constant 469 : index
    %73 = vector.load %arg5[%c0_105, %c469] : memref<4x806xf32, #tpu.memory_space<vmem>>, vector<4x16xf32>
    tpu.vector_store %arg5[%c0_105, %c469], %72 {strides = array<i32>} : memref<4x806xf32, #tpu.memory_space<vmem>>, vector<4x16xf32>,
    %c1_106 = arith.constant 1 : index
    %c0_107 = arith.constant 0 : index
    %c8_108 = arith.constant 8 : index
    %c0_109 = arith.constant 0 : index
    %74 = vector.load %arg1[%c1_106, %c0_107, %c8_108, %c0_109] : memref<2x4x16x16xf32, #tpu.memory_space<vmem>>, vector<1x4x1x16xf32>
    %75 = vector.shape_cast %74 : vector<1x4x1x16xf32> to vector<4x16xf32>
    %c0_110 = arith.constant 0 : index
    %c487 = arith.constant 487 : index
    %76 = vector.load %arg5[%c0_110, %c487] : memref<4x806xf32, #tpu.memory_space<vmem>>, vector<4x16xf32>
    tpu.vector_store %arg5[%c0_110, %c487], %75 {strides = array<i32>} : memref<4x806xf32, #tpu.memory_space<vmem>>, vector<4x16xf32>,
    %c1_111 = arith.constant 1 : index
    %c0_112 = arith.constant 0 : index
    %c9_113 = arith.constant 9 : index
    %c0_114 = arith.constant 0 : index
    %77 = vector.load %arg1[%c1_111, %c0_112, %c9_113, %c0_114] : memref<2x4x16x16xf32, #tpu.memory_space<vmem>>, vector<1x4x1x16xf32>
    %78 = vector.shape_cast %77 : vector<1x4x1x16xf32> to vector<4x16xf32>
    %c0_115 = arith.constant 0 : index
    %c505 = arith.constant 505 : index
    %79 = vector.load %arg5[%c0_115, %c505] : memref<4x806xf32, #tpu.memory_space<vmem>>, vector<4x16xf32>
    tpu.vector_store %arg5[%c0_115, %c505], %78 {strides = array<i32>} : memref<4x806xf32, #tpu.memory_space<vmem>>, vector<4x16xf32>,
    %c1_116 = arith.constant 1 : index
    %c0_117 = arith.constant 0 : index
    %c10_118 = arith.constant 10 : index
    %c0_119 = arith.constant 0 : index
    %80 = vector.load %arg1[%c1_116, %c0_117, %c10_118, %c0_119] : memref<2x4x16x16xf32, #tpu.memory_space<vmem>>, vector<1x4x1x16xf32>
    %81 = vector.shape_cast %80 : vector<1x4x1x16xf32> to vector<4x16xf32>
    %c0_120 = arith.constant 0 : index
    %c523 = arith.constant 523 : index
    %82 = vector.load %arg5[%c0_120, %c523] : memref<4x806xf32, #tpu.memory_space<vmem>>, vector<4x16xf32>
    tpu.vector_store %arg5[%c0_120, %c523], %81 {strides = array<i32>} : memref<4x806xf32, #tpu.memory_space<vmem>>, vector<4x16xf32>,
    %c1_121 = arith.constant 1 : index
    %c0_122 = arith.constant 0 : index
    %c11_123 = arith.constant 11 : index
    %c0_124 = arith.constant 0 : index
    %83 = vector.load %arg1[%c1_121, %c0_122, %c11_123, %c0_124] : memref<2x4x16x16xf32, #tpu.memory_space<vmem>>, vector<1x4x1x16xf32>
    %84 = vector.shape_cast %83 : vector<1x4x1x16xf32> to vector<4x16xf32>
    %c0_125 = arith.constant 0 : index
    %c541 = arith.constant 541 : index
    %85 = vector.load %arg5[%c0_125, %c541] : memref<4x806xf32, #tpu.memory_space<vmem>>, vector<4x16xf32>
    tpu.vector_store %arg5[%c0_125, %c541], %84 {strides = array<i32>} : memref<4x806xf32, #tpu.memory_space<vmem>>, vector<4x16xf32>,
    %c1_126 = arith.constant 1 : index
    %c0_127 = arith.constant 0 : index
    %c12_128 = arith.constant 12 : index
    %c0_129 = arith.constant 0 : index
    %86 = vector.load %arg1[%c1_126, %c0_127, %c12_128, %c0_129] : memref<2x4x16x16xf32, #tpu.memory_space<vmem>>, vector<1x4x1x16xf32>
    %87 = vector.shape_cast %86 : vector<1x4x1x16xf32> to vector<4x16xf32>
    %c0_130 = arith.constant 0 : index
    %c559 = arith.constant 559 : index
    %88 = vector.load %arg5[%c0_130, %c559] : memref<4x806xf32, #tpu.memory_space<vmem>>, vector<4x16xf32>
    tpu.vector_store %arg5[%c0_130, %c559], %87 {strides = array<i32>} : memref<4x806xf32, #tpu.memory_space<vmem>>, vector<4x16xf32>,
    %c1_131 = arith.constant 1 : index
    %c0_132 = arith.constant 0 : index
    %c13_133 = arith.constant 13 : index
    %c0_134 = arith.constant 0 : index
    %89 = vector.load %arg1[%c1_131, %c0_132, %c13_133, %c0_134] : memref<2x4x16x16xf32, #tpu.memory_space<vmem>>, vector<1x4x1x16xf32>
    %90 = vector.shape_cast %89 : vector<1x4x1x16xf32> to vector<4x16xf32>
    %c0_135 = arith.constant 0 : index
    %c577 = arith.constant 577 : index
    %91 = vector.load %arg5[%c0_135, %c577] : memref<4x806xf32, #tpu.memory_space<vmem>>, vector<4x16xf32>
    tpu.vector_store %arg5[%c0_135, %c577], %90 {strides = array<i32>} : memref<4x806xf32, #tpu.memory_space<vmem>>, vector<4x16xf32>,
    %c1_136 = arith.constant 1 : index
    %c0_137 = arith.constant 0 : index
    %c14_138 = arith.constant 14 : index
    %c0_139 = arith.constant 0 : index
    %92 = vector.load %arg1[%c1_136, %c0_137, %c14_138, %c0_139] : memref<2x4x16x16xf32, #tpu.memory_space<vmem>>, vector<1x4x1x16xf32>
    %93 = vector.shape_cast %92 : vector<1x4x1x16xf32> to vector<4x16xf32>
    %c0_140 = arith.constant 0 : index
    %c595 = arith.constant 595 : index
    %94 = vector.load %arg5[%c0_140, %c595] : memref<4x806xf32, #tpu.memory_space<vmem>>, vector<4x16xf32>
    tpu.vector_store %arg5[%c0_140, %c595], %93 {strides = array<i32>} : memref<4x806xf32, #tpu.memory_space<vmem>>, vector<4x16xf32>,
    %c1_141 = arith.constant 1 : index
    %c0_142 = arith.constant 0 : index
    %c15_143 = arith.constant 15 : index
    %c0_144 = arith.constant 0 : index
    %95 = vector.load %arg1[%c1_141, %c0_142, %c15_143, %c0_144] : memref<2x4x16x16xf32, #tpu.memory_space<vmem>>, vector<1x4x1x16xf32>
    %96 = vector.shape_cast %95 : vector<1x4x1x16xf32> to vector<4x16xf32>
    %c0_145 = arith.constant 0 : index
    %c613 = arith.constant 613 : index
    %97 = vector.load %arg5[%c0_145, %c613] : memref<4x806xf32, #tpu.memory_space<vmem>>, vector<4x16xf32>
    tpu.vector_store %arg5[%c0_145, %c613], %96 {strides = array<i32>} : memref<4x806xf32, #tpu.memory_space<vmem>>, vector<4x16xf32>,
    %c0_146 = arith.constant 0 : index
    %c0_147 = arith.constant 0 : index
    %98 = vector.load %arg5[%c0_146, %c0_147] : memref<4x806xf32, #tpu.memory_space<vmem>>, vector<4x768xf32>
    %c0_148 = arith.constant 0 : index
    %c0_149 = arith.constant 0 : index
    %99 = vector.load %arg6[%c0_148, %c0_149] : memref<36x768xf32, #tpu.memory_space<vmem>>, vector<4x768xf32>
    tpu.vector_store %arg6[%c0_148, %c0_149], %98 {strides = array<i32>} : memref<36x768xf32, #tpu.memory_space<vmem>>, vector<4x768xf32>,
    %c0_150 = arith.constant 0 : index
    %c1_151 = arith.constant 1 : index
    %100 = vector.load %arg5[%c0_150, %c1_151] : memref<4x806xf32, #tpu.memory_space<vmem>>, vector<4x768xf32>
    %c4_152 = arith.constant 4 : index
    %c0_153 = arith.constant 0 : index
    %101 = vector.load %arg6[%c4_152, %c0_153] : memref<36x768xf32, #tpu.memory_space<vmem>>, vector<4x768xf32>
    tpu.vector_store %arg6[%c4_152, %c0_153], %100 {strides = array<i32>} : memref<36x768xf32, #tpu.memory_space<vmem>>, vector<4x768xf32>,
    %c0_154 = arith.constant 0 : index
    %c2_155 = arith.constant 2 : index
    %102 = vector.load %arg5[%c0_154, %c2_155] : memref<4x806xf32, #tpu.memory_space<vmem>>, vector<4x768xf32>
    %c8_156 = arith.constant 8 : index
    %c0_157 = arith.constant 0 : index
    %103 = vector.load %arg6[%c8_156, %c0_157] : memref<36x768xf32, #tpu.memory_space<vmem>>, vector<4x768xf32>
    tpu.vector_store %arg6[%c8_156, %c0_157], %102 {strides = array<i32>} : memref<36x768xf32, #tpu.memory_space<vmem>>, vector<4x768xf32>,
    %c0_158 = arith.constant 0 : index
    %c18 = arith.constant 18 : index
    %104 = vector.load %arg5[%c0_158, %c18] : memref<4x806xf32, #tpu.memory_space<vmem>>, vector<4x768xf32>
    %c12_159 = arith.constant 12 : index
    %c0_160 = arith.constant 0 : index
    %105 = vector.load %arg6[%c12_159, %c0_160] : memref<36x768xf32, #tpu.memory_space<vmem>>, vector<4x768xf32>
    tpu.vector_store %arg6[%c12_159, %c0_160], %104 {strides = array<i32>} : memref<36x768xf32, #tpu.memory_space<vmem>>, vector<4x768xf32>,
    %c0_161 = arith.constant 0 : index
    %c19_162 = arith.constant 19 : index
    %106 = vector.load %arg5[%c0_161, %c19_162] : memref<4x806xf32, #tpu.memory_space<vmem>>, vector<4x768xf32>
    %c16 = arith.constant 16 : index
    %c0_163 = arith.constant 0 : index
    %107 = vector.load %arg6[%c16, %c0_163] : memref<36x768xf32, #tpu.memory_space<vmem>>, vector<4x768xf32>
    tpu.vector_store %arg6[%c16, %c0_163], %106 {strides = array<i32>} : memref<36x768xf32, #tpu.memory_space<vmem>>, vector<4x768xf32>,
    %c0_164 = arith.constant 0 : index
    %c20 = arith.constant 20 : index
    %108 = vector.load %arg5[%c0_164, %c20] : memref<4x806xf32, #tpu.memory_space<vmem>>, vector<4x768xf32>
    %c20_165 = arith.constant 20 : index
    %c0_166 = arith.constant 0 : index
    %109 = vector.load %arg6[%c20_165, %c0_166] : memref<36x768xf32, #tpu.memory_space<vmem>>, vector<4x768xf32>
    tpu.vector_store %arg6[%c20_165, %c0_166], %108 {strides = array<i32>} : memref<36x768xf32, #tpu.memory_space<vmem>>, vector<4x768xf32>,
    %c0_167 = arith.constant 0 : index
    %c36 = arith.constant 36 : index
    %110 = vector.load %arg5[%c0_167, %c36] : memref<4x806xf32, #tpu.memory_space<vmem>>, vector<4x768xf32>
    %c24 = arith.constant 24 : index
    %c0_168 = arith.constant 0 : index
    %111 = vector.load %arg6[%c24, %c0_168] : memref<36x768xf32, #tpu.memory_space<vmem>>, vector<4x768xf32>
    tpu.vector_store %arg6[%c24, %c0_168], %110 {strides = array<i32>} : memref<36x768xf32, #tpu.memory_space<vmem>>, vector<4x768xf32>,
    %c0_169 = arith.constant 0 : index
    %c37_170 = arith.constant 37 : index
    %112 = vector.load %arg5[%c0_169, %c37_170] : memref<4x806xf32, #tpu.memory_space<vmem>>, vector<4x768xf32>
    %c28 = arith.constant 28 : index
    %c0_171 = arith.constant 0 : index
    %113 = vector.load %arg6[%c28, %c0_171] : memref<36x768xf32, #tpu.memory_space<vmem>>, vector<4x768xf32>
    tpu.vector_store %arg6[%c28, %c0_171], %112 {strides = array<i32>} : memref<36x768xf32, #tpu.memory_space<vmem>>, vector<4x768xf32>,
    %c0_172 = arith.constant 0 : index
    %c38 = arith.constant 38 : index
    %114 = vector.load %arg5[%c0_172, %c38] : memref<4x806xf32, #tpu.memory_space<vmem>>, vector<4x768xf32>
    %c32 = arith.constant 32 : index
    %c0_173 = arith.constant 0 : index
    %115 = vector.load %arg6[%c32, %c0_173] : memref<36x768xf32, #tpu.memory_space<vmem>>, vector<4x768xf32>
    tpu.vector_store %arg6[%c32, %c0_173], %114 {strides = array<i32>} : memref<36x768xf32, #tpu.memory_space<vmem>>, vector<4x768xf32>,
    %c0_174 = arith.constant 0 : index
    %c0_175 = arith.constant 0 : index
    %116 = vector.load %arg2[%c0_174, %c0_175] : memref<8x36xf32, #tpu.memory_space<vmem>>, vector<8x36xf32>
    %cst_176 = arith.constant 0.235702261 : f32
    %117 = vector.broadcast %cst_176 : f32 to vector<8x36xf32>
    %118 = arith.mulf %116, %117 : vector<8x36xf32>
    %c0_177 = arith.constant 0 : index
    %c0_178 = arith.constant 0 : index
    %119 = vector.load %arg6[%c0_177, %c0_178] : memref<36x768xf32, #tpu.memory_space<vmem>>, vector<36x768xf32>
    %cst_179 = arith.constant dense<0.000000e+00> : vector<8x768xf32>
    %120 = tpu.matmul %118, %119, %cst_179 {dimension_numbers = #tpu.dot_dimension_numbers<[1], [0], [0], [1], [0, 0, 1, 1], [], []>} : vector<8x36xf32>, vector<36x768xf32>, vector<8x768xf32> -> vector<8x768xf32>
    %c0_180 = arith.constant 0 : index
    %c0_181 = arith.constant 0 : index
    %121 = vector.load %arg3[%c0_180, %c0_181] : memref<8x1xf32, #tpu.memory_space<vmem>>, vector<8x1xf32>
    %122 = vector.broadcast %121 : vector<8x1xf32> to vector<8x768xf32>
    %123 = arith.addf %120, %122 : vector<8x768xf32>
    %124 = vector.extract_strided_slice %123 {offsets = [0, 0], sizes = [8, 16], strides = [1, 1]} : vector<8x768xf32> to vector<8x16xf32>
    %c0_182 = arith.constant 0 : index
    %c0_183 = arith.constant 0 : index
    %c0_184 = arith.constant 0 : index
    %125 = vector.load %arg4[%c0_182, %c0_183, %c0_184] : memref<2x8x256xf32, #tpu.memory_space<vmem>>, vector<1x8x16xf32>
    %126 = vector.shape_cast %125 : vector<1x8x16xf32> to vector<8x16xf32>
    %127 = vector.shape_cast %124 : vector<8x16xf32> to vector<1x8x16xf32>
    tpu.vector_store %arg4[%c0_182, %c0_183, %c0_184], %127 {strides = array<i32>} : memref<2x8x256xf32, #tpu.memory_space<vmem>>, vector<1x8x16xf32>,
    %128 = vector.extract_strided_slice %123 {offsets = [0, 18], sizes = [8, 16], strides = [1, 1]} : vector<8x768xf32> to vector<8x16xf32>
    %c0_185 = arith.constant 0 : index
    %c0_186 = arith.constant 0 : index
    %c16_187 = arith.constant 16 : index
    %129 = vector.load %arg4[%c0_185, %c0_186, %c16_187] : memref<2x8x256xf32, #tpu.memory_space<vmem>>, vector<1x8x16xf32>
    %130 = vector.shape_cast %129 : vector<1x8x16xf32> to vector<8x16xf32>
    %131 = vector.shape_cast %128 : vector<8x16xf32> to vector<1x8x16xf32>
    tpu.vector_store %arg4[%c0_185, %c0_186, %c16_187], %131 {strides = array<i32>} : memref<2x8x256xf32, #tpu.memory_space<vmem>>, vector<1x8x16xf32>,
    %132 = vector.extract_strided_slice %123 {offsets = [0, 36], sizes = [8, 16], strides = [1, 1]} : vector<8x768xf32> to vector<8x16xf32>
    %c0_188 = arith.constant 0 : index
    %c0_189 = arith.constant 0 : index
    %c32_190 = arith.constant 32 : index
    %133 = vector.load %arg4[%c0_188, %c0_189, %c32_190] : memref<2x8x256xf32, #tpu.memory_space<vmem>>, vector<1x8x16xf32>
    %134 = vector.shape_cast %133 : vector<1x8x16xf32> to vector<8x16xf32>
    %135 = vector.shape_cast %132 : vector<8x16xf32> to vector<1x8x16xf32>
    tpu.vector_store %arg4[%c0_188, %c0_189, %c32_190], %135 {strides = array<i32>} : memref<2x8x256xf32, #tpu.memory_space<vmem>>, vector<1x8x16xf32>,
    %136 = vector.extract_strided_slice %123 {offsets = [0, 54], sizes = [8, 16], strides = [1, 1]} : vector<8x768xf32> to vector<8x16xf32>
    %c0_191 = arith.constant 0 : index
    %c0_192 = arith.constant 0 : index
    %c48 = arith.constant 48 : index
    %137 = vector.load %arg4[%c0_191, %c0_192, %c48] : memref<2x8x256xf32, #tpu.memory_space<vmem>>, vector<1x8x16xf32>
    %138 = vector.shape_cast %137 : vector<1x8x16xf32> to vector<8x16xf32>
    %139 = vector.shape_cast %136 : vector<8x16xf32> to vector<1x8x16xf32>
    tpu.vector_store %arg4[%c0_191, %c0_192, %c48], %139 {strides = array<i32>} : memref<2x8x256xf32, #tpu.memory_space<vmem>>, vector<1x8x16xf32>,
    %140 = vector.extract_strided_slice %123 {offsets = [0, 72], sizes = [8, 16], strides = [1, 1]} : vector<8x768xf32> to vector<8x16xf32>
    %c0_193 = arith.constant 0 : index
    %c0_194 = arith.constant 0 : index
    %c64 = arith.constant 64 : index
    %141 = vector.load %arg4[%c0_193, %c0_194, %c64] : memref<2x8x256xf32, #tpu.memory_space<vmem>>, vector<1x8x16xf32>
    %142 = vector.shape_cast %141 : vector<1x8x16xf32> to vector<8x16xf32>
    %143 = vector.shape_cast %140 : vector<8x16xf32> to vector<1x8x16xf32>
    tpu.vector_store %arg4[%c0_193, %c0_194, %c64], %143 {strides = array<i32>} : memref<2x8x256xf32, #tpu.memory_space<vmem>>, vector<1x8x16xf32>,
    %144 = vector.extract_strided_slice %123 {offsets = [0, 90], sizes = [8, 16], strides = [1, 1]} : vector<8x768xf32> to vector<8x16xf32>
    %c0_195 = arith.constant 0 : index
    %c0_196 = arith.constant 0 : index
    %c80 = arith.constant 80 : index
    %145 = vector.load %arg4[%c0_195, %c0_196, %c80] : memref<2x8x256xf32, #tpu.memory_space<vmem>>, vector<1x8x16xf32>
    %146 = vector.shape_cast %145 : vector<1x8x16xf32> to vector<8x16xf32>
    %147 = vector.shape_cast %144 : vector<8x16xf32> to vector<1x8x16xf32>
    tpu.vector_store %arg4[%c0_195, %c0_196, %c80], %147 {strides = array<i32>} : memref<2x8x256xf32, #tpu.memory_space<vmem>>, vector<1x8x16xf32>,
    %148 = vector.extract_strided_slice %123 {offsets = [0, 108], sizes = [8, 16], strides = [1, 1]} : vector<8x768xf32> to vector<8x16xf32>
    %c0_197 = arith.constant 0 : index
    %c0_198 = arith.constant 0 : index
    %c96 = arith.constant 96 : index
    %149 = vector.load %arg4[%c0_197, %c0_198, %c96] : memref<2x8x256xf32, #tpu.memory_space<vmem>>, vector<1x8x16xf32>
    %150 = vector.shape_cast %149 : vector<1x8x16xf32> to vector<8x16xf32>
    %151 = vector.shape_cast %148 : vector<8x16xf32> to vector<1x8x16xf32>
    tpu.vector_store %arg4[%c0_197, %c0_198, %c96], %151 {strides = array<i32>} : memref<2x8x256xf32, #tpu.memory_space<vmem>>, vector<1x8x16xf32>,
    %152 = vector.extract_strided_slice %123 {offsets = [0, 126], sizes = [8, 16], strides = [1, 1]} : vector<8x768xf32> to vector<8x16xf32>
    %c0_199 = arith.constant 0 : index
    %c0_200 = arith.constant 0 : index
    %c112 = arith.constant 112 : index
    %153 = vector.load %arg4[%c0_199, %c0_200, %c112] : memref<2x8x256xf32, #tpu.memory_space<vmem>>, vector<1x8x16xf32>
    %154 = vector.shape_cast %153 : vector<1x8x16xf32> to vector<8x16xf32>
    %155 = vector.shape_cast %152 : vector<8x16xf32> to vector<1x8x16xf32>
    tpu.vector_store %arg4[%c0_199, %c0_200, %c112], %155 {strides = array<i32>} : memref<2x8x256xf32, #tpu.memory_space<vmem>>, vector<1x8x16xf32>,
    %156 = vector.extract_strided_slice %123 {offsets = [0, 144], sizes = [8, 16], strides = [1, 1]} : vector<8x768xf32> to vector<8x16xf32>
    %c0_201 = arith.constant 0 : index
    %c0_202 = arith.constant 0 : index
    %c128 = arith.constant 128 : index
    %157 = vector.load %arg4[%c0_201, %c0_202, %c128] : memref<2x8x256xf32, #tpu.memory_space<vmem>>, vector<1x8x16xf32>
    %158 = vector.shape_cast %157 : vector<1x8x16xf32> to vector<8x16xf32>
    %159 = vector.shape_cast %156 : vector<8x16xf32> to vector<1x8x16xf32>
    tpu.vector_store %arg4[%c0_201, %c0_202, %c128], %159 {strides = array<i32>} : memref<2x8x256xf32, #tpu.memory_space<vmem>>, vector<1x8x16xf32>,
    %160 = vector.extract_strided_slice %123 {offsets = [0, 162], sizes = [8, 16], strides = [1, 1]} : vector<8x768xf32> to vector<8x16xf32>
    %c0_203 = arith.constant 0 : index
    %c0_204 = arith.constant 0 : index
    %c144 = arith.constant 144 : index
    %161 = vector.load %arg4[%c0_203, %c0_204, %c144] : memref<2x8x256xf32, #tpu.memory_space<vmem>>, vector<1x8x16xf32>
    %162 = vector.shape_cast %161 : vector<1x8x16xf32> to vector<8x16xf32>
    %163 = vector.shape_cast %160 : vector<8x16xf32> to vector<1x8x16xf32>
    tpu.vector_store %arg4[%c0_203, %c0_204, %c144], %163 {strides = array<i32>} : memref<2x8x256xf32, #tpu.memory_space<vmem>>, vector<1x8x16xf32>,
    %164 = vector.extract_strided_slice %123 {offsets = [0, 180], sizes = [8, 16], strides = [1, 1]} : vector<8x768xf32> to vector<8x16xf32>
    %c0_205 = arith.constant 0 : index
    %c0_206 = arith.constant 0 : index
    %c160 = arith.constant 160 : index
    %165 = vector.load %arg4[%c0_205, %c0_206, %c160] : memref<2x8x256xf32, #tpu.memory_space<vmem>>, vector<1x8x16xf32>
    %166 = vector.shape_cast %165 : vector<1x8x16xf32> to vector<8x16xf32>
    %167 = vector.shape_cast %164 : vector<8x16xf32> to vector<1x8x16xf32>
    tpu.vector_store %arg4[%c0_205, %c0_206, %c160], %167 {strides = array<i32>} : memref<2x8x256xf32, #tpu.memory_space<vmem>>, vector<1x8x16xf32>,
    %168 = vector.extract_strided_slice %123 {offsets = [0, 198], sizes = [8, 16], strides = [1, 1]} : vector<8x768xf32> to vector<8x16xf32>
    %c0_207 = arith.constant 0 : index
    %c0_208 = arith.constant 0 : index
    %c176 = arith.constant 176 : index
    %169 = vector.load %arg4[%c0_207, %c0_208, %c176] : memref<2x8x256xf32, #tpu.memory_space<vmem>>, vector<1x8x16xf32>
    %170 = vector.shape_cast %169 : vector<1x8x16xf32> to vector<8x16xf32>
    %171 = vector.shape_cast %168 : vector<8x16xf32> to vector<1x8x16xf32>
    tpu.vector_store %arg4[%c0_207, %c0_208, %c176], %171 {strides = array<i32>} : memref<2x8x256xf32, #tpu.memory_space<vmem>>, vector<1x8x16xf32>,
    %172 = vector.extract_strided_slice %123 {offsets = [0, 216], sizes = [8, 16], strides = [1, 1]} : vector<8x768xf32> to vector<8x16xf32>
    %c0_209 = arith.constant 0 : index
    %c0_210 = arith.constant 0 : index
    %c192 = arith.constant 192 : index
    %173 = vector.load %arg4[%c0_209, %c0_210, %c192] : memref<2x8x256xf32, #tpu.memory_space<vmem>>, vector<1x8x16xf32>
    %174 = vector.shape_cast %173 : vector<1x8x16xf32> to vector<8x16xf32>
    %175 = vector.shape_cast %172 : vector<8x16xf32> to vector<1x8x16xf32>
    tpu.vector_store %arg4[%c0_209, %c0_210, %c192], %175 {strides = array<i32>} : memref<2x8x256xf32, #tpu.memory_space<vmem>>, vector<1x8x16xf32>,
    %176 = vector.extract_strided_slice %123 {offsets = [0, 234], sizes = [8, 16], strides = [1, 1]} : vector<8x768xf32> to vector<8x16xf32>
    %c0_211 = arith.constant 0 : index
    %c0_212 = arith.constant 0 : index
    %c208 = arith.constant 208 : index
    %177 = vector.load %arg4[%c0_211, %c0_212, %c208] : memref<2x8x256xf32, #tpu.memory_space<vmem>>, vector<1x8x16xf32>
    %178 = vector.shape_cast %177 : vector<1x8x16xf32> to vector<8x16xf32>
    %179 = vector.shape_cast %176 : vector<8x16xf32> to vector<1x8x16xf32>
    tpu.vector_store %arg4[%c0_211, %c0_212, %c208], %179 {strides = array<i32>} : memref<2x8x256xf32, #tpu.memory_space<vmem>>, vector<1x8x16xf32>,
    %180 = vector.extract_strided_slice %123 {offsets = [0, 252], sizes = [8, 16], strides = [1, 1]} : vector<8x768xf32> to vector<8x16xf32>
    %c0_213 = arith.constant 0 : index
    %c0_214 = arith.constant 0 : index
    %c224 = arith.constant 224 : index
    %181 = vector.load %arg4[%c0_213, %c0_214, %c224] : memref<2x8x256xf32, #tpu.memory_space<vmem>>, vector<1x8x16xf32>
    %182 = vector.shape_cast %181 : vector<1x8x16xf32> to vector<8x16xf32>
    %183 = vector.shape_cast %180 : vector<8x16xf32> to vector<1x8x16xf32>
    tpu.vector_store %arg4[%c0_213, %c0_214, %c224], %183 {strides = array<i32>} : memref<2x8x256xf32, #tpu.memory_space<vmem>>, vector<1x8x16xf32>,
    %184 = vector.extract_strided_slice %123 {offsets = [0, 270], sizes = [8, 16], strides = [1, 1]} : vector<8x768xf32> to vector<8x16xf32>
    %c0_215 = arith.constant 0 : index
    %c0_216 = arith.constant 0 : index
    %c240 = arith.constant 240 : index
    %185 = vector.load %arg4[%c0_215, %c0_216, %c240] : memref<2x8x256xf32, #tpu.memory_space<vmem>>, vector<1x8x16xf32>
    %186 = vector.shape_cast %185 : vector<1x8x16xf32> to vector<8x16xf32>
    %187 = vector.shape_cast %184 : vector<8x16xf32> to vector<1x8x16xf32>
    tpu.vector_store %arg4[%c0_215, %c0_216, %c240], %187 {strides = array<i32>} : memref<2x8x256xf32, #tpu.memory_space<vmem>>, vector<1x8x16xf32>,
    %188 = vector.extract_strided_slice %123 {offsets = [0, 324], sizes = [8, 16], strides = [1, 1]} : vector<8x768xf32> to vector<8x16xf32>
    %c1_217 = arith.constant 1 : index
    %c0_218 = arith.constant 0 : index
    %c0_219 = arith.constant 0 : index
    %189 = vector.load %arg4[%c1_217, %c0_218, %c0_219] : memref<2x8x256xf32, #tpu.memory_space<vmem>>, vector<1x8x16xf32>
    %190 = vector.shape_cast %189 : vector<1x8x16xf32> to vector<8x16xf32>
    %191 = vector.shape_cast %188 : vector<8x16xf32> to vector<1x8x16xf32>
    tpu.vector_store %arg4[%c1_217, %c0_218, %c0_219], %191 {strides = array<i32>} : memref<2x8x256xf32, #tpu.memory_space<vmem>>, vector<1x8x16xf32>,
    %192 = vector.extract_strided_slice %123 {offsets = [0, 342], sizes = [8, 16], strides = [1, 1]} : vector<8x768xf32> to vector<8x16xf32>
    %c1_220 = arith.constant 1 : index
    %c0_221 = arith.constant 0 : index
    %c16_222 = arith.constant 16 : index
    %193 = vector.load %arg4[%c1_220, %c0_221, %c16_222] : memref<2x8x256xf32, #tpu.memory_space<vmem>>, vector<1x8x16xf32>
    %194 = vector.shape_cast %193 : vector<1x8x16xf32> to vector<8x16xf32>
    %195 = vector.shape_cast %192 : vector<8x16xf32> to vector<1x8x16xf32>
    tpu.vector_store %arg4[%c1_220, %c0_221, %c16_222], %195 {strides = array<i32>} : memref<2x8x256xf32, #tpu.memory_space<vmem>>, vector<1x8x16xf32>,
    %196 = vector.extract_strided_slice %123 {offsets = [0, 360], sizes = [8, 16], strides = [1, 1]} : vector<8x768xf32> to vector<8x16xf32>
    %c1_223 = arith.constant 1 : index
    %c0_224 = arith.constant 0 : index
    %c32_225 = arith.constant 32 : index
    %197 = vector.load %arg4[%c1_223, %c0_224, %c32_225] : memref<2x8x256xf32, #tpu.memory_space<vmem>>, vector<1x8x16xf32>
    %198 = vector.shape_cast %197 : vector<1x8x16xf32> to vector<8x16xf32>
    %199 = vector.shape_cast %196 : vector<8x16xf32> to vector<1x8x16xf32>
    tpu.vector_store %arg4[%c1_223, %c0_224, %c32_225], %199 {strides = array<i32>} : memref<2x8x256xf32, #tpu.memory_space<vmem>>, vector<1x8x16xf32>,
    %200 = vector.extract_strided_slice %123 {offsets = [0, 378], sizes = [8, 16], strides = [1, 1]} : vector<8x768xf32> to vector<8x16xf32>
    %c1_226 = arith.constant 1 : index
    %c0_227 = arith.constant 0 : index
    %c48_228 = arith.constant 48 : index
    %201 = vector.load %arg4[%c1_226, %c0_227, %c48_228] : memref<2x8x256xf32, #tpu.memory_space<vmem>>, vector<1x8x16xf32>
    %202 = vector.shape_cast %201 : vector<1x8x16xf32> to vector<8x16xf32>
    %203 = vector.shape_cast %200 : vector<8x16xf32> to vector<1x8x16xf32>
    tpu.vector_store %arg4[%c1_226, %c0_227, %c48_228], %203 {strides = array<i32>} : memref<2x8x256xf32, #tpu.memory_space<vmem>>, vector<1x8x16xf32>,
    %204 = vector.extract_strided_slice %123 {offsets = [0, 396], sizes = [8, 16], strides = [1, 1]} : vector<8x768xf32> to vector<8x16xf32>
    %c1_229 = arith.constant 1 : index
    %c0_230 = arith.constant 0 : index
    %c64_231 = arith.constant 64 : index
    %205 = vector.load %arg4[%c1_229, %c0_230, %c64_231] : memref<2x8x256xf32, #tpu.memory_space<vmem>>, vector<1x8x16xf32>
    %206 = vector.shape_cast %205 : vector<1x8x16xf32> to vector<8x16xf32>
    %207 = vector.shape_cast %204 : vector<8x16xf32> to vector<1x8x16xf32>
    tpu.vector_store %arg4[%c1_229, %c0_230, %c64_231], %207 {strides = array<i32>} : memref<2x8x256xf32, #tpu.memory_space<vmem>>, vector<1x8x16xf32>,
    %208 = vector.extract_strided_slice %123 {offsets = [0, 414], sizes = [8, 16], strides = [1, 1]} : vector<8x768xf32> to vector<8x16xf32>
    %c1_232 = arith.constant 1 : index
    %c0_233 = arith.constant 0 : index
    %c80_234 = arith.constant 80 : index
    %209 = vector.load %arg4[%c1_232, %c0_233, %c80_234] : memref<2x8x256xf32, #tpu.memory_space<vmem>>, vector<1x8x16xf32>
    %210 = vector.shape_cast %209 : vector<1x8x16xf32> to vector<8x16xf32>
    %211 = vector.shape_cast %208 : vector<8x16xf32> to vector<1x8x16xf32>
    tpu.vector_store %arg4[%c1_232, %c0_233, %c80_234], %211 {strides = array<i32>} : memref<2x8x256xf32, #tpu.memory_space<vmem>>, vector<1x8x16xf32>,
    %212 = vector.extract_strided_slice %123 {offsets = [0, 432], sizes = [8, 16], strides = [1, 1]} : vector<8x768xf32> to vector<8x16xf32>
    %c1_235 = arith.constant 1 : index
    %c0_236 = arith.constant 0 : index
    %c96_237 = arith.constant 96 : index
    %213 = vector.load %arg4[%c1_235, %c0_236, %c96_237] : memref<2x8x256xf32, #tpu.memory_space<vmem>>, vector<1x8x16xf32>
    %214 = vector.shape_cast %213 : vector<1x8x16xf32> to vector<8x16xf32>
    %215 = vector.shape_cast %212 : vector<8x16xf32> to vector<1x8x16xf32>
    tpu.vector_store %arg4[%c1_235, %c0_236, %c96_237], %215 {strides = array<i32>} : memref<2x8x256xf32, #tpu.memory_space<vmem>>, vector<1x8x16xf32>,
    %216 = vector.extract_strided_slice %123 {offsets = [0, 450], sizes = [8, 16], strides = [1, 1]} : vector<8x768xf32> to vector<8x16xf32>
    %c1_238 = arith.constant 1 : index
    %c0_239 = arith.constant 0 : index
    %c112_240 = arith.constant 112 : index
    %217 = vector.load %arg4[%c1_238, %c0_239, %c112_240] : memref<2x8x256xf32, #tpu.memory_space<vmem>>, vector<1x8x16xf32>
    %218 = vector.shape_cast %217 : vector<1x8x16xf32> to vector<8x16xf32>
    %219 = vector.shape_cast %216 : vector<8x16xf32> to vector<1x8x16xf32>
    tpu.vector_store %arg4[%c1_238, %c0_239, %c112_240], %219 {strides = array<i32>} : memref<2x8x256xf32, #tpu.memory_space<vmem>>, vector<1x8x16xf32>,
    %220 = vector.extract_strided_slice %123 {offsets = [0, 468], sizes = [8, 16], strides = [1, 1]} : vector<8x768xf32> to vector<8x16xf32>
    %c1_241 = arith.constant 1 : index
    %c0_242 = arith.constant 0 : index
    %c128_243 = arith.constant 128 : index
    %221 = vector.load %arg4[%c1_241, %c0_242, %c128_243] : memref<2x8x256xf32, #tpu.memory_space<vmem>>, vector<1x8x16xf32>
    %222 = vector.shape_cast %221 : vector<1x8x16xf32> to vector<8x16xf32>
    %223 = vector.shape_cast %220 : vector<8x16xf32> to vector<1x8x16xf32>
    tpu.vector_store %arg4[%c1_241, %c0_242, %c128_243], %223 {strides = array<i32>} : memref<2x8x256xf32, #tpu.memory_space<vmem>>, vector<1x8x16xf32>,
    %224 = vector.extract_strided_slice %123 {offsets = [0, 486], sizes = [8, 16], strides = [1, 1]} : vector<8x768xf32> to vector<8x16xf32>
    %c1_244 = arith.constant 1 : index
    %c0_245 = arith.constant 0 : index
    %c144_246 = arith.constant 144 : index
    %225 = vector.load %arg4[%c1_244, %c0_245, %c144_246] : memref<2x8x256xf32, #tpu.memory_space<vmem>>, vector<1x8x16xf32>
    %226 = vector.shape_cast %225 : vector<1x8x16xf32> to vector<8x16xf32>
    %227 = vector.shape_cast %224 : vector<8x16xf32> to vector<1x8x16xf32>
    tpu.vector_store %arg4[%c1_244, %c0_245, %c144_246], %227 {strides = array<i32>} : memref<2x8x256xf32, #tpu.memory_space<vmem>>, vector<1x8x16xf32>,
    %228 = vector.extract_strided_slice %123 {offsets = [0, 504], sizes = [8, 16], strides = [1, 1]} : vector<8x768xf32> to vector<8x16xf32>
    %c1_247 = arith.constant 1 : index
    %c0_248 = arith.constant 0 : index
    %c160_249 = arith.constant 160 : index
    %229 = vector.load %arg4[%c1_247, %c0_248, %c160_249] : memref<2x8x256xf32, #tpu.memory_space<vmem>>, vector<1x8x16xf32>
    %230 = vector.shape_cast %229 : vector<1x8x16xf32> to vector<8x16xf32>
    %231 = vector.shape_cast %228 : vector<8x16xf32> to vector<1x8x16xf32>
    tpu.vector_store %arg4[%c1_247, %c0_248, %c160_249], %231 {strides = array<i32>} : memref<2x8x256xf32, #tpu.memory_space<vmem>>, vector<1x8x16xf32>,
    %232 = vector.extract_strided_slice %123 {offsets = [0, 522], sizes = [8, 16], strides = [1, 1]} : vector<8x768xf32> to vector<8x16xf32>
    %c1_250 = arith.constant 1 : index
    %c0_251 = arith.constant 0 : index
    %c176_252 = arith.constant 176 : index
    %233 = vector.load %arg4[%c1_250, %c0_251, %c176_252] : memref<2x8x256xf32, #tpu.memory_space<vmem>>, vector<1x8x16xf32>
    %234 = vector.shape_cast %233 : vector<1x8x16xf32> to vector<8x16xf32>
    %235 = vector.shape_cast %232 : vector<8x16xf32> to vector<1x8x16xf32>
    tpu.vector_store %arg4[%c1_250, %c0_251, %c176_252], %235 {strides = array<i32>} : memref<2x8x256xf32, #tpu.memory_space<vmem>>, vector<1x8x16xf32>,
    %236 = vector.extract_strided_slice %123 {offsets = [0, 540], sizes = [8, 16], strides = [1, 1]} : vector<8x768xf32> to vector<8x16xf32>
    %c1_253 = arith.constant 1 : index
    %c0_254 = arith.constant 0 : index
    %c192_255 = arith.constant 192 : index
    %237 = vector.load %arg4[%c1_253, %c0_254, %c192_255] : memref<2x8x256xf32, #tpu.memory_space<vmem>>, vector<1x8x16xf32>
    %238 = vector.shape_cast %237 : vector<1x8x16xf32> to vector<8x16xf32>
    %239 = vector.shape_cast %236 : vector<8x16xf32> to vector<1x8x16xf32>
    tpu.vector_store %arg4[%c1_253, %c0_254, %c192_255], %239 {strides = array<i32>} : memref<2x8x256xf32, #tpu.memory_space<vmem>>, vector<1x8x16xf32>,
    %240 = vector.extract_strided_slice %123 {offsets = [0, 558], sizes = [8, 16], strides = [1, 1]} : vector<8x768xf32> to vector<8x16xf32>
    %c1_256 = arith.constant 1 : index
    %c0_257 = arith.constant 0 : index
    %c208_258 = arith.constant 208 : index
    %241 = vector.load %arg4[%c1_256, %c0_257, %c208_258] : memref<2x8x256xf32, #tpu.memory_space<vmem>>, vector<1x8x16xf32>
    %242 = vector.shape_cast %241 : vector<1x8x16xf32> to vector<8x16xf32>
    %243 = vector.shape_cast %240 : vector<8x16xf32> to vector<1x8x16xf32>
    tpu.vector_store %arg4[%c1_256, %c0_257, %c208_258], %243 {strides = array<i32>} : memref<2x8x256xf32, #tpu.memory_space<vmem>>, vector<1x8x16xf32>,
    %244 = vector.extract_strided_slice %123 {offsets = [0, 576], sizes = [8, 16], strides = [1, 1]} : vector<8x768xf32> to vector<8x16xf32>
    %c1_259 = arith.constant 1 : index
    %c0_260 = arith.constant 0 : index
    %c224_261 = arith.constant 224 : index
    %245 = vector.load %arg4[%c1_259, %c0_260, %c224_261] : memref<2x8x256xf32, #tpu.memory_space<vmem>>, vector<1x8x16xf32>
    %246 = vector.shape_cast %245 : vector<1x8x16xf32> to vector<8x16xf32>
    %247 = vector.shape_cast %244 : vector<8x16xf32> to vector<1x8x16xf32>
    tpu.vector_store %arg4[%c1_259, %c0_260, %c224_261], %247 {strides = array<i32>} : memref<2x8x256xf32, #tpu.memory_space<vmem>>, vector<1x8x16xf32>,
    %248 = vector.extract_strided_slice %123 {offsets = [0, 594], sizes = [8, 16], strides = [1, 1]} : vector<8x768xf32> to vector<8x16xf32>
    %c1_262 = arith.constant 1 : index
    %c0_263 = arith.constant 0 : index
    %c240_264 = arith.constant 240 : index
    %249 = vector.load %arg4[%c1_262, %c0_263, %c240_264] : memref<2x8x256xf32, #tpu.memory_space<vmem>>, vector<1x8x16xf32>
    %250 = vector.shape_cast %249 : vector<1x8x16xf32> to vector<8x16xf32>
    %251 = vector.shape_cast %248 : vector<8x16xf32> to vector<1x8x16xf32>
    tpu.vector_store %arg4[%c1_262, %c0_263, %c240_264], %251 {strides = array<i32>} : memref<2x8x256xf32, #tpu.memory_space<vmem>>, vector<1x8x16xf32>,
    return
  }
  func.func @transform_0(%arg0: i32) -> (i32, i32, i32, i32) {
    %c0_i32 = arith.constant 0 : i32
    %c0_i32_0 = arith.constant 0 : i32
    %c0_i32_1 = arith.constant 0 : i32
    %c0_i32_2 = arith.constant 0 : i32
    return %arg0, %c0_i32, %c0_i32_0, %c0_i32_1 : i32, i32, i32, i32
  }
  func.func @transform_1(%arg0: i32) -> (i32, i32) {
    %c0_i32 = arith.constant 0 : i32
    %c0_i32_0 = arith.constant 0 : i32
    %c0_i32_1 = arith.constant 0 : i32
    return %c0_i32, %c0_i32_0 : i32, i32
  }
  func.func @transform_2(%arg0: i32) -> (i32, i32) {
    %c0_i32 = arith.constant 0 : i32
    %c0_i32_0 = arith.constant 0 : i32
    %c0_i32_1 = arith.constant 0 : i32
    return %c0_i32, %c0_i32_0 : i32, i32
  }
  func.func @transform_3(%arg0: i32) -> (i32, i32, i32) {
    %c0_i32 = arith.constant 0 : i32
    %c0_i32_0 = arith.constant 0 : i32
    %c0_i32_1 = arith.constant 0 : i32
    return %arg0, %c0_i32, %c0_i32_0 : i32, i32, i32
  }
}

</mosaic_0001>

<bundles_post_ra>
// kernel: tpu_custom_call.1
= control target key start
LH: loop header
LB: loop body
LE: loop exit
PB: predicated region body
PF: predicated region fallthrough
CT: control target
= control target key end

     0   :  { %8 = vsyncpa [#allocation5], 0  ;;  %s2283_s0 = inlined_call_operand.hbm [shape: f32[2,4,16,16], index: 0, kind: input, shape index: {}]   ;;  %s2284_s1 = inlined_call_operand.vmem [shape: f32[8,36], index: 1, kind: input, shape index: {}]   ;;  %s2285_s2 = inlined_call_operand.vmem [shape: f32[8,1], index: 2, kind: input, shape index: {}]   ;;  %s2286_s3 = inlined_call_operand.hbm [shape: f32[2,8,256], index: 3, kind: output, shape index: {}]  }
   0x1   :  { %9 = vsyncpa [#allocation6], 0  ;;  %s1748_s12 = smov [#allocation4]   ;;  %s1700_s16 = scalar_lea.hbm %s2283_s0, 2048 }
   0x2   :  { %s15_s13 = sshll.u32 %s1748_s12, 4  ;;  %p1701_p0 = scmp.ne.s32.totalorder %s2283_s0, %s1700_s16  ;;  %s16_s13 = int_to_ptr.vmem [resolvable:$true] %s15_s13 }
   0x3   :  { %p1704_p1 = scmp.lt.u32.totalorder %s1700_s16, %s2283_s0 }
   0x5   :  { %p1706_p2 = pnand %p1704_p1, %p1701_p0 }
   0x7   :  { %1709 = shalt.err (!%p1706_p2)
}
   0x8   :  { %s1710_s21 = scalar_lea.vmem %s16_s13, 2048  ;;  %p1715_p4 = scmp.lt.s32.totalorder %s16_s13, %s16_s13 }
   0x9   :  { %p1711_p3 = scmp.ne.s32.totalorder %s16_s13, %s1710_s21  ;;  %p1716_p5 = scmp.lt.s32.totalorder %s1710_s21, %s1710_s21 }
   0xb   :  { %p1717_p6 = por %p1716_p5, %p1715_p4 }
   0xd   :  { %p1718_p7 = pnand %p1717_p6, %p1711_p3 }
   0xf   :  { %1721 = shalt.err (!%p1718_p7)
}
  0x10   :  { %s1749_s22 = smov 128   ;;  %s1750_s23 = smov 8  }
  0x11   :  { %21 = dma.hbm_to_vmem [thread:$0]  %s2283_s0, 2048, %s16_s13, [#allocation5], %s1749_s22, %s1749_s22, %s1750_s23  }
  0x12   :  { %1744 = dma.done.wait [#allocation5], 2048  }
  0x13   :  { %1745 = vsyncadd [#allocation5], 4294965248  ;;  %vm32_vm0 = vcmask 306176   ;;  %v1751_v0 = vmov 0.0   ;;  %vm43_vm1 = vcmask 1041409   ;;  %vm45_vm2 = vcmask 1045509  }
  0x14   :  { %29 = vst [vmem:[#allocation2] sm:$0xff] %v1751_v0  ;;  %31 = vst [vmem:[#allocation2 + $0x10] sm:$0xff] %v1751_v0  ;;  %1263 = vmatprep.mubr.f32.mxu0 %v1751_v0  ;;  %1334 = vmatprep.mubr.f32.mxu1 %v1751_v0  ;;  %vm48_vm3 = vcmask 1042434   ;;  %vm50_vm4 = vcmask 1046534   ;;  %v84_v1 = vld [vmem:[#allocation4 + $0x2] sm:$0x1] }
  0x15   :  { %33 = vst.msk [vmem:[#allocation2 + $0x18] sm:$0xf] %vm32_vm0, %v1751_v0  ;;  %30 = vst [vmem:[#allocation2 + $0x8] sm:$0xff] %v1751_v0  ;;  %v85_v2 = vld [vmem:[#allocation4 + $0x12] sm:$0x1]  ;;  %vm53_vm5 = vcmask 1043459  }
  0x16   :  { %v86_v3 = vld [vmem:[#allocation4 + $0x22] sm:$0x1]  ;;  %v87_v4 = vld [vmem:[#allocation4 + $0x32] sm:$0x1]  ;;  %v92_v5 = vrot.slane %v85_v2, 7  ;;  %vm55_vm6 = vcmask 1047559  }
  0x17   :  { %v95_v6 = vrot.slane %v86_v3, 6  ;;  %v34_v7 = vld [vmem:[#allocation4] sm:$0x1]  ;;  %v98_v8 = vrot.slane %v87_v4, 5  ;;  %v35_v9 = vld [vmem:[#allocation4 + $0x10] sm:$0x1] }
  0x18   :  { %v36_v10 = vld [vmem:[#allocation4 + $0x20] sm:$0x1]  ;;  %v93_v11 = vsel %vm43_vm1, %v92_v5, %v84_v1  ;;  %v37_v12 = vld [vmem:[#allocation4 + $0x30] sm:$0x1]  ;;  %v42_v13 = vrot.slane %v35_v9, 7  ;;  %s1752_s0 = smov 55  }
  0x19   :  { %v47_v14 = vrot.slane %v36_v10, 6  ;;  %v106_v15 = vld [vmem:[#allocation4 + $0x3] sm:$0x1]  ;;  %v94_v16 = vsel %vm45_vm2, %v92_v5, %v93_v11  ;;  %v52_v17 = vrot.slane %v37_v12, 5  ;;  %v107_v18 = vld [vmem:[#allocation4 + $0x13] sm:$0x1] }
  0x1a   :  { %v108_v19 = vld [vmem:[#allocation4 + $0x23] sm:$0x1]  ;;  %v96_v20 = vsel %vm48_vm3, %v95_v6, %v94_v16  ;;  %v44_v21 = vsel %vm43_vm1, %v42_v13, %v34_v7  ;;  %v109_v22 = vld [vmem:[#allocation4 + $0x33] sm:$0x1]  ;;  %v114_v23 = vrot.slane %v107_v18, 7  ;;  %s1753_s26 = smov 19  }
  0x1b   :  { %v117_v24 = vrot.slane %v108_v19, 6  ;;  %v62_v25 = vld [vmem:[#allocation4 + $0x1] sm:$0x1]  ;;  %v97_v26 = vsel %vm50_vm4, %v95_v6, %v96_v20  ;;  %v46_v27 = vsel %vm45_vm2, %v42_v13, %v44_v21  ;;  %v120_v28 = vrot.slane %v109_v22, 5  ;;  %v63_v29 = vld [vmem:[#allocation4 + $0x11] sm:$0x1] }
  0x1c   :  { %v64_v30 = vld [vmem:[#allocation4 + $0x21] sm:$0x1]  ;;  %v99_v31 = vsel %vm53_vm5, %v98_v8, %v97_v26  ;;  %v49_v32 = vsel %vm48_vm3, %v47_v14, %v46_v27  ;;  %v115_v33 = vsel %vm43_vm1, %v114_v23, %v106_v15  ;;  %v65_v34 = vld [vmem:[#allocation4 + $0x31] sm:$0x1]  ;;  %v70_v35 = vrot.slane %v63_v29, 7  ;;  %s1754_s27 = smov 73  }
  0x1d   :  { %v100_v36 = vsel %vm55_vm6, %v98_v8, %v99_v31  ;;  %v51_v37 = vsel %vm50_vm4, %v47_v14, %v49_v32  ;;  %v116_v38 = vsel %vm45_vm2, %v114_v23, %v115_v33  ;;  %v73_v39 = vrot.slane %v64_v30, 6  ;;  %v129_v40 = vld [vmem:[#allocation4 + $0x14] sm:$0x1]  ;;  %v130_v41 = vld [vmem:[#allocation4 + $0x24] sm:$0x1]  ;;  %s1755_s28 = smov 37  }
  0x1e   :  { %101 = vrot.lane.b32.xlu1 %v100_v36, %s1752_s0  ;;  %v54_v42 = vsel %vm53_vm5, %v52_v17, %v51_v37  ;;  %v118_v43 = vsel %vm48_vm3, %v117_v24, %v116_v38  ;;  %v71_v44 = vsel %vm43_vm1, %v70_v35, %v62_v25  ;;  %v76_v45 = vrot.slane %v65_v34, 5  ;;  %v128_v46 = vld [vmem:[#allocation4 + $0x4] sm:$0x1]  ;;  %v131_v47 = vld [vmem:[#allocation4 + $0x34] sm:$0x1]  ;;  %s1756_s29 = smov 91  }
  0x1f   :  { %v56_v48 = vsel %vm55_vm6, %v52_v17, %v54_v42  ;;  %v119_v49 = vsel %vm50_vm4, %v117_v24, %v118_v43  ;;  %v72_v50 = vsel %vm45_vm2, %v70_v35, %v71_v44  ;;  %v136_v51 = vrot.slane %v129_v40, 7  ;;  %v173_v52 = vld [vmem:[#allocation4 + $0x16] sm:$0x1]  ;;  %v174_v53 = vld [vmem:[#allocation4 + $0x26] sm:$0x1]  ;;  %s1757_s30 = smov 127  }
  0x20   :  { %57 = vrot.lane.b32.xlu0 %v56_v48, %s1753_s26  ;;  %v121_v54 = vsel %vm53_vm5, %v120_v28, %v119_v49  ;;  %v74_v55 = vsel %vm48_vm3, %v73_v39, %v72_v50  ;;  %v139_v56 = vrot.slane %v130_v41, 6  ;;  %v142_v57 = vrot.slane %v131_v47, 5  ;;  %v172_v58 = vld [vmem:[#allocation4 + $0x6] sm:$0x1]  ;;  %v175_v59 = vld [vmem:[#allocation4 + $0x36] sm:$0x1] }
  0x21   :  { %v122_v60 = vsel %vm55_vm6, %v120_v28, %v121_v54  ;;  %v75_v61 = vsel %vm50_vm4, %v73_v39, %v74_v55  ;;  %v137_v62 = vsel %vm43_vm1, %v136_v51, %v128_v46  ;;  %v180_v63 = vrot.slane %v173_v52, 7  ;;  %v200_v1 = vld [vmem:[#allocation4 + $0x17] sm:$0x1]  ;;  %v201_v2 = vld [vmem:[#allocation4 + $0x27] sm:$0x1]  ;;  %s1758_s4 = smov 17  }
  0x22   :  { %123 = vrot.lane.b32.xlu1 %v122_v60, %s1754_s27  ;;  %v77_v3 = vsel %vm53_vm5, %v76_v45, %v75_v61  ;;  %v138_v4 = vsel %vm45_vm2, %v136_v51, %v137_v62  ;;  %v183_v5 = vrot.slane %v174_v53, 6  ;;  %v186_v6 = vrot.slane %v175_v59, 5  ;;  %v199_v7 = vld [vmem:[#allocation4 + $0x7] sm:$0x1]  ;;  %v202_v8 = vld [vmem:[#allocation4 + $0x37] sm:$0x1] }
  0x23   :  { %v78_v9 = vsel %vm55_vm6, %v76_v45, %v77_v3  ;;  %v140_v10 = vsel %vm48_vm3, %v139_v56, %v138_v4  ;;  %v181_v11 = vsel %vm43_vm1, %v180_v63, %v172_v58  ;;  %v207_v12 = vrot.slane %v200_v1, 7  ;;  %v151_v13 = vld [vmem:[#allocation4 + $0x15] sm:$0x1]  ;;  %v152_v14 = vld [vmem:[#allocation4 + $0x25] sm:$0x1]  ;;  %s1759_s5 = smov 109  }
  0x24   :  { %79 = vrot.lane.b32.xlu0 %v78_v9, %s1755_s28  ;;  %v141_v15 = vsel %vm50_vm4, %v139_v56, %v140_v10  ;;  %v182_v16 = vsel %vm45_vm2, %v180_v63, %v181_v11  ;;  %v210_v17 = vrot.slane %v201_v2, 6  ;;  %v213_v18 = vrot.slane %v202_v8, 5  ;;  %v150_v19 = vld [vmem:[#allocation4 + $0x5] sm:$0x1]  ;;  %v153_v20 = vld [vmem:[#allocation4 + $0x35] sm:$0x1] }
  0x25   :  { %v143_v21 = vsel %vm53_vm5, %v142_v57, %v141_v15  ;;  %v184_v22 = vsel %vm48_vm3, %v183_v5, %v182_v16  ;;  %v208_v23 = vsel %vm43_vm1, %v207_v12, %v199_v7  ;;  %v158_v24 = vrot.slane %v151_v13, 7  ;;  %v244_v25 = vld [vmem:[#allocation4 + $0x19] sm:$0x1]  ;;  %v245_v30 = vld [vmem:[#allocation4 + $0x29] sm:$0x1]  ;;  %s1760_s6 = smov 53  }
  0x26   :  { %v144_v26 = vsel %vm55_vm6, %v142_v57, %v143_v21  ;;  %v185_v27 = vsel %vm50_vm4, %v183_v5, %v184_v22  ;;  %v209_v28 = vsel %vm45_vm2, %v207_v12, %v208_v23  ;;  %v161_v29 = vrot.slane %v152_v14, 6  ;;  %v246_v31 = vld [vmem:[#allocation4 + $0x39] sm:$0x1]  ;;  %v243_v36 = vld [vmem:[#allocation4 + $0x9] sm:$0x1]  ;;  %s1761_s7 = smov 35  }
  0x27   :  { %145 = vrot.lane.b32.xlu1 %v144_v26, %s1756_s29  ;;  %v187_v32 = vsel %vm53_vm5, %v186_v6, %v185_v27  ;;  %v211_v33 = vsel %vm48_vm3, %v210_v17, %v209_v28  ;;  %v159_v34 = vsel %vm43_vm1, %v158_v24, %v150_v19  ;;  %v164_v35 = vrot.slane %v153_v20, 5  ;;  %v222_v37 = vld [vmem:[#allocation4 + $0x18] sm:$0x1]  ;;  %v223_v42 = vld [vmem:[#allocation4 + $0x28] sm:$0x1]  ;;  %s1762_s8 = smov 125  }
  0x28   :  { %v188_v38 = vsel %vm55_vm6, %v186_v6, %v187_v32  ;;  %v212_v39 = vsel %vm50_vm4, %v210_v17, %v211_v33  ;;  %v160_v40 = vsel %vm45_vm2, %v158_v24, %v159_v34  ;;  %v251_v41 = vrot.slane %v244_v25, 7  ;;  %v224_v43 = vld [vmem:[#allocation4 + $0x38] sm:$0x1]  ;;  %v221_v48 = vld [vmem:[#allocation4 + $0x8] sm:$0x1]  ;;  %s1763_s9 = smov 71  }
  0x29   :  { %189 = vrot.lane.b32.xlu0 %v188_v38, %s1757_s30  ;;  %v214_v44 = vsel %vm53_vm5, %v213_v18, %v212_v39  ;;  %v162_v45 = vsel %vm48_vm3, %v161_v29, %v160_v40  ;;  %v254_v46 = vrot.slane %v245_v30, 6  ;;  %v257_v47 = vrot.slane %v246_v31, 5  ;;  %v332_v49 = vld [vmem:[#allocation4 + $0x1d] sm:$0x1]  ;;  %v333_v54 = vld [vmem:[#allocation4 + $0x2d] sm:$0x1] }
  0x2a   :  { %v215_v50 = vsel %vm55_vm6, %v213_v18, %v214_v44  ;;  %v163_v51 = vsel %vm50_vm4, %v161_v29, %v162_v45  ;;  %v252_v52 = vsel %vm43_vm1, %v251_v41, %v243_v36  ;;  %v229_v53 = vrot.slane %v222_v37, 7  ;;  %v334_v55 = vld [vmem:[#allocation4 + $0x3d] sm:$0x1]  ;;  %v331_v60 = vld [vmem:[#allocation4 + $0xd] sm:$0x1]  ;;  %s1764_s10 = smov 89  }
  0x2b   :  { %216 = vrot.lane.b32.xlu1 %v215_v50, %s1758_s4  ;;  %v165_v56 = vsel %vm53_vm5, %v164_v35, %v163_v51  ;;  %v253_v57 = vsel %vm45_vm2, %v251_v41, %v252_v52  ;;  %v232_v58 = vrot.slane %v223_v42, 6  ;;  %v235_v59 = vrot.slane %v224_v43, 5  ;;  %v266_v61 = vld [vmem:[#allocation4 + $0x1a] sm:$0x1]  ;;  %v267_v3 = vld [vmem:[#allocation4 + $0x2a] sm:$0x1] }
  0x2c   :  { %v166_v62 = vsel %vm55_vm6, %v164_v35, %v165_v56  ;;  %v255_v63 = vsel %vm48_vm3, %v254_v46, %v253_v57  ;;  %v230_v1 = vsel %vm43_vm1, %v229_v53, %v221_v48  ;;  %v339_v2 = vrot.slane %v332_v49, 7  ;;  %v265_v8 = vld [vmem:[#allocation4 + $0xa] sm:$0x1]  ;;  %v268_v9 = vld [vmem:[#allocation4 + $0x3a] sm:$0x1]  ;;  %s1765_s11 = smov 107  }
  0x2d   :  { %167 = vrot.lane.b32.xlu0 %v166_v62, %s1759_s5  ;;  %v256_v4 = vsel %vm50_vm4, %v254_v46, %v255_v63  ;;  %v231_v5 = vsel %vm45_vm2, %v229_v53, %v230_v1  ;;  %v342_v6 = vrot.slane %v333_v54, 6  ;;  %v345_v7 = vrot.slane %v334_v55, 5  ;;  %v288_v14 = vld [vmem:[#allocation4 + $0x1b] sm:$0x1]  ;;  %v289_v19 = vld [vmem:[#allocation4 + $0x2b] sm:$0x1] }
  0x2e   :  { %v258_v10 = vsel %vm53_vm5, %v257_v47, %v256_v4  ;;  %v233_v11 = vsel %vm48_vm3, %v232_v58, %v231_v5  ;;  %v340_v12 = vsel %vm43_vm1, %v339_v2, %v331_v60  ;;  %v273_v13 = vrot.slane %v266_v61, 7  ;;  %v290_v20 = vld [vmem:[#allocation4 + $0x3b] sm:$0x1]  ;;  %v287_v25 = vld [vmem:[#allocation4 + $0xb] sm:$0x1]  ;;  %s1766_s12 = smov 15  }
  0x2f   :  { %v259_v15 = vsel %vm55_vm6, %v257_v47, %v258_v10  ;;  %v234_v16 = vsel %vm50_vm4, %v232_v58, %v233_v11  ;;  %v341_v17 = vsel %vm45_vm2, %v339_v2, %v340_v12  ;;  %v276_v18 = vrot.slane %v267_v3, 6  ;;  %v310_v26 = vld [vmem:[#allocation4 + $0x1c] sm:$0x1]  ;;  %v311_v31 = vld [vmem:[#allocation4 + $0x2c] sm:$0x1]  ;;  %s1767_s13 = smov 33  }
  0x30   :  { %260 = vrot.lane.b32.xlu1 %v259_v15, %s1760_s6  ;;  %v236_v21 = vsel %vm53_vm5, %v235_v59, %v234_v16  ;;  %v343_v22 = vsel %vm48_vm3, %v342_v6, %v341_v17  ;;  %v274_v23 = vsel %vm43_vm1, %v273_v13, %v265_v8  ;;  %v279_v24 = vrot.slane %v268_v9, 5  ;;  %v312_v32 = vld [vmem:[#allocation4 + $0x3c] sm:$0x1]  ;;  %v309_v37 = vld [vmem:[#allocation4 + $0xc] sm:$0x1]  ;;  %s1768_s14 = smov 123  }
  0x31   :  { %v237_v27 = vsel %vm55_vm6, %v235_v59, %v236_v21  ;;  %v344_v28 = vsel %vm50_vm4, %v342_v6, %v343_v22  ;;  %v275_v29 = vsel %vm45_vm2, %v273_v13, %v274_v23  ;;  %v295_v30 = vrot.slane %v288_v14, 7  ;;  %v359_v38 = vld [vmem:[#allocation4 + $0x1e] sm:$0x1]  ;;  %v360_v43 = vld [vmem:[#allocation4 + $0x2e] sm:$0x1]  ;;  %s1769_s15 = smov 87  }
  0x32   :  { %238 = vrot.lane.b32.xlu0 %v237_v27, %s1761_s7  ;;  %v346_v33 = vsel %vm53_vm5, %v345_v7, %v344_v28  ;;  %v277_v34 = vsel %vm48_vm3, %v276_v18, %v275_v29  ;;  %v298_v35 = vrot.slane %v289_v19, 6  ;;  %v301_v36 = vrot.slane %v290_v20, 5  ;;  %v361_v44 = vld [vmem:[#allocation4 + $0x3e] sm:$0x1]  ;;  %v358_v49 = vld [vmem:[#allocation4 + $0xe] sm:$0x1] }
  0x33   :  { %v347_v39 = vsel %vm55_vm6, %v345_v7, %v346_v33  ;;  %v278_v40 = vsel %vm50_vm4, %v276_v18, %v277_v34  ;;  %v296_v41 = vsel %vm43_vm1, %v295_v30, %v287_v25  ;;  %v317_v42 = vrot.slane %v310_v26, 7  ;;  %v381_v50 = vld [vmem:[#allocation4 + $0x1f] sm:$0x1]  ;;  %v382_v55 = vld [vmem:[#allocation4 + $0x2f] sm:$0x1]  ;;  %s1770_s16 = smov 105  }
  0x34   :  { %348 = vrot.lane.b32.xlu1 %v347_v39, %s1762_s8  ;;  %v280_v45 = vsel %vm53_vm5, %v279_v24, %v278_v40  ;;  %v297_v46 = vsel %vm45_vm2, %v295_v30, %v296_v41  ;;  %v320_v47 = vrot.slane %v311_v31, 6  ;;  %v323_v48 = vrot.slane %v312_v32, 5  ;;  %v380_v60 = vld [vmem:[#allocation4 + $0xf] sm:$0x1]  ;;  %v383_v61 = vld [vmem:[#allocation4 + $0x3f] sm:$0x1] }
  0x35   :  { %v281_v51 = vsel %vm55_vm6, %v279_v24, %v280_v45  ;;  %v299_v52 = vsel %vm48_vm3, %v298_v35, %v297_v46  ;;  %v318_v53 = vsel %vm43_vm1, %v317_v42, %v309_v37  ;;  %v366_v54 = vrot.slane %v359_v38, 7  ;;  %v448_v3 = vld [vmem:[#allocation4 + $0x52] sm:$0x1]  ;;  %v449_v8 = vld [vmem:[#allocation4 + $0x62] sm:$0x1]  ;;  %s1771_s17 = smov 13  }
  0x36   :  { %282 = vrot.lane.b32.xlu0 %v281_v51, %s1763_s9  ;;  %v300_v56 = vsel %vm50_vm4, %v298_v35, %v299_v52  ;;  %v319_v57 = vsel %vm45_vm2, %v317_v42, %v318_v53  ;;  %v369_v58 = vrot.slane %v360_v43, 6  ;;  %v372_v59 = vrot.slane %v361_v44, 5  ;;  %v450_v9 = vld [vmem:[#allocation4 + $0x72] sm:$0x1]  ;;  %v447_v14 = vld [vmem:[#allocation4 + $0x42] sm:$0x1] }
  0x37   :  { %v302_v62 = vsel %vm53_vm5, %v301_v36, %v300_v56  ;;  %v321_v63 = vsel %vm48_vm3, %v320_v47, %v319_v57  ;;  %v367_v1 = vsel %vm43_vm1, %v366_v54, %v358_v49  ;;  %v388_v2 = vrot.slane %v381_v50, 7  ;;  %v404_v15 = vld [vmem:[#allocation4 + $0x50] sm:$0x1]  ;;  %v405_v20 = vld [vmem:[#allocation4 + $0x60] sm:$0x1]  ;;  %s1772_s18 = smov 31  }
  0x38   :  { %v303_v4 = vsel %vm55_vm6, %v301_v36, %v302_v62  ;;  %v322_v5 = vsel %vm50_vm4, %v320_v47, %v321_v63  ;;  %v368_v6 = vsel %vm45_vm2, %v366_v54, %v367_v1  ;;  %v391_v7 = vrot.slane %v382_v55, 6  ;;  %v406_v21 = vld [vmem:[#allocation4 + $0x70] sm:$0x1]  ;;  %v403_v26 = vld [vmem:[#allocation4 + $0x40] sm:$0x1]  ;;  %s1773_s19 = smov 49  }
  0x39   :  { %v324_v10 = vsel %vm53_vm5, %v323_v48, %v322_v5  ;;  %v370_v11 = vsel %vm48_vm3, %v369_v58, %v368_v6  ;;  %v389_v12 = vsel %vm43_vm1, %v388_v2, %v380_v60  ;;  %v394_v13 = vrot.slane %v383_v61, 5  ;;  %v426_v27 = vld [vmem:[#allocation4 + $0x51] sm:$0x1]  ;;  %v427_v32 = vld [vmem:[#allocation4 + $0x61] sm:$0x1]  ;;  %s1774_s20 = smov 67  }
  0x3a   :  { %304 = vrot.lane.b32.xlu0 %v303_v4, %s1764_s10  ;;  %v325_v16 = vsel %vm55_vm6, %v323_v48, %v324_v10  ;;  %v371_v17 = vsel %vm50_vm4, %v369_v58, %v370_v11  ;;  %v390_v18 = vsel %vm45_vm2, %v388_v2, %v389_v12  ;;  %v455_v19 = vrot.slane %v448_v3, 7  ;;  %v428_v33 = vld [vmem:[#allocation4 + $0x71] sm:$0x1]  ;;  %v425_v38 = vld [vmem:[#allocation4 + $0x41] sm:$0x1]  ;;  %s1775_s21 = smov 121  }
  0x3b   :  { %326 = vrot.lane.b32.xlu1 %v325_v16, %s1765_s11  ;;  %v373_v22 = vsel %vm53_vm5, %v372_v59, %v371_v17  ;;  %v392_v23 = vsel %vm48_vm3, %v391_v7, %v390_v18  ;;  %v458_v24 = vrot.slane %v449_v8, 6  ;;  %v461_v25 = vrot.slane %v450_v9, 5  ;;  %v475_v39 = vld [vmem:[#allocation4 + $0x53] sm:$0x1]  ;;  %v476_v44 = vld [vmem:[#allocation4 + $0x63] sm:$0x1] }
  0x3c   :  { %v374_v28 = vsel %vm55_vm6, %v372_v59, %v373_v22  ;;  %v393_v29 = vsel %vm50_vm4, %v391_v7, %v392_v23  ;;  %v456_v30 = vsel %vm43_vm1, %v455_v19, %v447_v14  ;;  %v411_v31 = vrot.slane %v404_v15, 7  ;;  %v474_v49 = vld [vmem:[#allocation4 + $0x43] sm:$0x1]  ;;  %v477_v50 = vld [vmem:[#allocation4 + $0x73] sm:$0x1]  ;;  %s1776_s22 = smov 85  }
  0x3d   :  { %v395_v34 = vsel %vm53_vm5, %v394_v13, %v393_v29  ;;  %v457_v35 = vsel %vm45_vm2, %v455_v19, %v456_v30  ;;  %v414_v36 = vrot.slane %v405_v20, 6  ;;  %v417_v37 = vrot.slane %v406_v21, 5  ;;  %v497_v55 = vld [vmem:[#allocation4 + $0x54] sm:$0x1]  ;;  %v498_v60 = vld [vmem:[#allocation4 + $0x64] sm:$0x1] }
  0x3e   :  { %375 = vrot.lane.b32.xlu0 %v374_v28, %s1766_s12  ;;  %v396_v40 = vsel %vm55_vm6, %v394_v13, %v395_v34  ;;  %v459_v41 = vsel %vm48_vm3, %v458_v24, %v457_v35  ;;  %v412_v42 = vsel %vm43_vm1, %v411_v31, %v403_v26  ;;  %v433_v43 = vrot.slane %v426_v27, 7  ;;  %v499_v61 = vld [vmem:[#allocation4 + $0x74] sm:$0x1]  ;;  %v496_v3 = vld [vmem:[#allocation4 + $0x44] sm:$0x1]  ;;  %s1777_s23 = smov 103  }
  0x3f   :  { %397 = vrot.lane.b32.xlu1 %v396_v40, %s1767_s13  ;;  %v460_v45 = vsel %vm50_vm4, %v458_v24, %v459_v41  ;;  %v413_v46 = vsel %vm45_vm2, %v411_v31, %v412_v42  ;;  %v436_v47 = vrot.slane %v427_v32, 6  ;;  %v439_v48 = vrot.slane %v428_v33, 5  ;;  %v519_v4 = vld [vmem:[#allocation4 + $0x55] sm:$0x1]  ;;  %v520_v9 = vld [vmem:[#allocation4 + $0x65] sm:$0x1] }
  0x40   :  { %v462_v51 = vsel %vm53_vm5, %v461_v25, %v460_v45  ;;  %v415_v52 = vsel %vm48_vm3, %v414_v36, %v413_v46  ;;  %v434_v53 = vsel %vm43_vm1, %v433_v43, %v425_v38  ;;  %v482_v54 = vrot.slane %v475_v39, 7  ;;  %v521_v10 = vld [vmem:[#allocation4 + $0x75] sm:$0x1]  ;;  %v518_v15 = vld [vmem:[#allocation4 + $0x45] sm:$0x1]  ;;  %s1778_s24 = smov 11  }
  0x41   :  { %v463_v56 = vsel %vm55_vm6, %v461_v25, %v462_v51  ;;  %v416_v57 = vsel %vm50_vm4, %v414_v36, %v415_v52  ;;  %v435_v58 = vsel %vm45_vm2, %v433_v43, %v434_v53  ;;  %v485_v59 = vrot.slane %v476_v44, 6  ;;  %v541_v16 = vld [vmem:[#allocation4 + $0x56] sm:$0x1]  ;;  %v542_v21 = vld [vmem:[#allocation4 + $0x66] sm:$0x1]  ;;  %s1779_s25 = smov 29  }
  0x42   :  { %464 = vrot.lane.b32.xlu0 %v463_v56, %s1768_s14  ;;  %v418_v62 = vsel %vm53_vm5, %v417_v37, %v416_v57  ;;  %v437_v63 = vsel %vm48_vm3, %v436_v47, %v435_v58  ;;  %v483_v1 = vsel %vm43_vm1, %v482_v54, %v474_v49  ;;  %v488_v2 = vrot.slane %v477_v50, 5  ;;  %v543_v22 = vld [vmem:[#allocation4 + $0x76] sm:$0x1]  ;;  %v540_v27 = vld [vmem:[#allocation4 + $0x46] sm:$0x1]  ;;  %s1780_s0 = smov 47  }
  0x43   :  { %v419_v5 = vsel %vm55_vm6, %v417_v37, %v418_v62  ;;  %v438_v6 = vsel %vm50_vm4, %v436_v47, %v437_v63  ;;  %v484_v7 = vsel %vm45_vm2, %v482_v54, %v483_v1  ;;  %v504_v8 = vrot.slane %v497_v55, 7  ;;  %v607_v28 = vld [vmem:[#allocation4 + $0x59] sm:$0x1]  ;;  %v608_v33 = vld [vmem:[#allocation4 + $0x69] sm:$0x1]  ;;  %s1781_s26 = smov 65  }
  0x44   :  { %420 = vrot.lane.b32.xlu1 %v419_v5, %s1769_s15  ;;  %v440_v11 = vsel %vm53_vm5, %v439_v48, %v438_v6  ;;  %v486_v12 = vsel %vm48_vm3, %v485_v59, %v484_v7  ;;  %v507_v13 = vrot.slane %v498_v60, 6  ;;  %v510_v14 = vrot.slane %v499_v61, 5  ;;  %v606_v38 = vld [vmem:[#allocation4 + $0x49] sm:$0x1]  ;;  %v609_v39 = vld [vmem:[#allocation4 + $0x79] sm:$0x1] }
  0x45   :  { %v441_v17 = vsel %vm55_vm6, %v439_v48, %v440_v11  ;;  %v487_v18 = vsel %vm50_vm4, %v485_v59, %v486_v12  ;;  %v505_v19 = vsel %vm43_vm1, %v504_v8, %v496_v3  ;;  %v526_v20 = vrot.slane %v519_v4, 7  ;;  %v563_v44 = vld [vmem:[#allocation4 + $0x57] sm:$0x1]  ;;  %v564_v49 = vld [vmem:[#allocation4 + $0x67] sm:$0x1]  ;;  %s1782_s27 = smov 83  }
  0x46   :  { %442 = vrot.lane.b32.xlu0 %v441_v17, %s1770_s16  ;;  %v489_v23 = vsel %vm53_vm5, %v488_v2, %v487_v18  ;;  %v506_v24 = vsel %vm45_vm2, %v504_v8, %v505_v19  ;;  %v529_v25 = vrot.slane %v520_v9, 6  ;;  %v532_v26 = vrot.slane %v521_v10, 5  ;;  %v565_v50 = vld [vmem:[#allocation4 + $0x77] sm:$0x1]  ;;  %v562_v55 = vld [vmem:[#allocation4 + $0x47] sm:$0x1] }
  0x47   :  { %v490_v29 = vsel %vm55_vm6, %v488_v2, %v489_v23  ;;  %v508_v30 = vsel %vm48_vm3, %v507_v13, %v506_v24  ;;  %v527_v31 = vsel %vm43_vm1, %v526_v20, %v518_v15  ;;  %v548_v32 = vrot.slane %v541_v16, 7  ;;  %v585_v56 = vld [vmem:[#allocation4 + $0x58] sm:$0x1]  ;;  %v586_v61 = vld [vmem:[#allocation4 + $0x68] sm:$0x1]  ;;  %s1783_s28 = smov 101  }
  0x48   :  { %491 = vrot.lane.b32.xlu1 %v490_v29, %s1771_s17  ;;  %v509_v34 = vsel %vm50_vm4, %v507_v13, %v508_v30  ;;  %v528_v35 = vsel %vm45_vm2, %v526_v20, %v527_v31  ;;  %v551_v36 = vrot.slane %v542_v21, 6  ;;  %v554_v37 = vrot.slane %v543_v22, 5  ;;  %v587_v62 = vld [vmem:[#allocation4 + $0x78] sm:$0x1]  ;;  %v584_v4 = vld [vmem:[#allocation4 + $0x48] sm:$0x1] }
  0x49   :  { %v511_v40 = vsel %vm53_vm5, %v510_v14, %v509_v34  ;;  %v530_v41 = vsel %vm48_vm3, %v529_v25, %v528_v35  ;;  %v549_v42 = vsel %vm43_vm1, %v548_v32, %v540_v27  ;;  %v614_v43 = vrot.slane %v607_v28, 7  ;;  %v634_v5 = vld [vmem:[#allocation4 + $0x5a] sm:$0x1]  ;;  %v635_v10 = vld [vmem:[#allocation4 + $0x6a] sm:$0x1]  ;;  %s1784_s4 = smov 126  }
  0x4a   :  { %v512_v45 = vsel %vm55_vm6, %v510_v14, %v511_v40  ;;  %v531_v46 = vsel %vm50_vm4, %v529_v25, %v530_v41  ;;  %v550_v47 = vsel %vm45_vm2, %v548_v32, %v549_v42  ;;  %v617_v48 = vrot.slane %v608_v33, 6  ;;  %v636_v11 = vld [vmem:[#allocation4 + $0x7a] sm:$0x1]  ;;  %v633_v16 = vld [vmem:[#allocation4 + $0x4a] sm:$0x1]  ;;  %s1785_s6 = smov 108  }
  0x4b   :  { %513 = vrot.lane.b32.xlu0 %v512_v45, %s1772_s18  ;;  %v533_v51 = vsel %vm53_vm5, %v532_v26, %v531_v46  ;;  %v552_v52 = vsel %vm48_vm3, %v551_v36, %v550_v47  ;;  %v615_v53 = vsel %vm43_vm1, %v614_v43, %v606_v38  ;;  %v620_v54 = vrot.slane %v609_v39, 5  ;;  %v656_v17 = vld [vmem:[#allocation4 + $0x5b] sm:$0x1]  ;;  %v657_v22 = vld [vmem:[#allocation4 + $0x6b] sm:$0x1]  ;;  %s1786_s7 = smov 110  }
  0x4c   :  { %v534_v57 = vsel %vm55_vm6, %v532_v26, %v533_v51  ;;  %v553_v58 = vsel %vm50_vm4, %v551_v36, %v552_v52  ;;  %v616_v59 = vsel %vm45_vm2, %v614_v43, %v615_v53  ;;  %v570_v60 = vrot.slane %v563_v44, 7  ;;  %v655_v27 = vld [vmem:[#allocation4 + $0x4b] sm:$0x1]  ;;  %v658_v28 = vld [vmem:[#allocation4 + $0x7b] sm:$0x1]  ;;  %s1787_s8 = smov 92  }
  0x4d   :  { %535 = vrot.lane.b32.xlu1 %v534_v57, %s1773_s19  ;;  %v555_v63 = vsel %vm53_vm5, %v554_v37, %v553_v58  ;;  %v618_v1 = vsel %vm48_vm3, %v617_v48, %v616_v59  ;;  %v573_v2 = vrot.slane %v564_v49, 6  ;;  %v576_v3 = vrot.slane %v565_v50, 5  ;;  %v677_v33 = vld [vmem:[#allocation4 + $0x4c] sm:$0x1]  ;;  %v678_v34 = vld [vmem:[#allocation4 + $0x5c] sm:$0x1] }
  0x4e   :  { %v556_v6 = vsel %vm55_vm6, %v554_v37, %v555_v63  ;;  %v619_v7 = vsel %vm50_vm4, %v617_v48, %v618_v1  ;;  %v571_v8 = vsel %vm43_vm1, %v570_v60, %v562_v55  ;;  %v592_v9 = vrot.slane %v585_v56, 7  ;;  %v679_v39 = vld [vmem:[#allocation4 + $0x6c] sm:$0x1]  ;;  %v680_v40 = vld [vmem:[#allocation4 + $0x7c] sm:$0x1]  ;;  %s1788_s9 = smov 90  }
  0x4f   :  { %557 = vrot.lane.b32.xlu0 %v556_v6, %s1774_s20  ;;  %v621_v12 = vsel %vm53_vm5, %v620_v54, %v619_v7  ;;  %v572_v13 = vsel %vm45_vm2, %v570_v60, %v571_v8  ;;  %v595_v14 = vrot.slane %v586_v61, 6  ;;  %v598_v15 = vrot.slane %v587_v62, 5  ;;  %v699_v45 = vld [vmem:[#allocation4 + $0x4d] sm:$0x1]  ;;  %v700_v46 = vld [vmem:[#allocation4 + $0x5d] sm:$0x1] }
  0x50   :  { %v622_v18 = vsel %vm55_vm6, %v620_v54, %v621_v12  ;;  %v574_v19 = vsel %vm48_vm3, %v573_v2, %v572_v13  ;;  %v593_v20 = vsel %vm43_vm1, %v592_v9, %v584_v4  ;;  %v641_v21 = vrot.slane %v634_v5, 7  ;;  %v701_v47 = vld [vmem:[#allocation4 + $0x6d] sm:$0x1]  ;;  %v702_v52 = vld [vmem:[#allocation4 + $0x7d] sm:$0x1]  ;;  %s1791_s10 = smov 114  }
  0x51   :  { %623 = vrot.lane.b32.xlu1 %v622_v18, %s1775_s21  ;;  %v575_v23 = vsel %vm50_vm4, %v573_v2, %v574_v19  ;;  %v594_v24 = vsel %vm45_vm2, %v592_v9, %v593_v20  ;;  %v644_v25 = vrot.slane %v635_v10, 6  ;;  %v647_v26 = vrot.slane %v636_v11, 5  ;;  %v721_v57 = vld [vmem:[#allocation4 + $0x4e] sm:$0x1]  ;;  %v722_v58 = vld [vmem:[#allocation4 + $0x5e] sm:$0x1] }
  0x52   :  { %v577_v29 = vsel %vm53_vm5, %v576_v3, %v575_v23  ;;  %v596_v30 = vsel %vm48_vm3, %v595_v14, %v594_v24  ;;  %v642_v31 = vsel %vm43_vm1, %v641_v21, %v633_v16  ;;  %v663_v32 = vrot.slane %v656_v17, 7  ;;  %v723_v63 = vld [vmem:[#allocation4 + $0x6e] sm:$0x1]  ;;  %v724_v1 = vld [vmem:[#allocation4 + $0x7e] sm:$0x1]  ;;  %s1792_s11 = smov 124  }
  0x53   :  { %v578_v35 = vsel %vm55_vm6, %v576_v3, %v577_v29  ;;  %v597_v36 = vsel %vm50_vm4, %v595_v14, %v596_v30  ;;  %v643_v37 = vsel %vm45_vm2, %v641_v21, %v642_v31  ;;  %v666_v38 = vrot.slane %v657_v22, 6  ;;  %v744_v6 = vld [vmem:[#allocation4 + $0x5f] sm:$0x1]  ;;  %v745_v11 = vld [vmem:[#allocation4 + $0x6f] sm:$0x1]  ;;  %s1793_s12 = smov 112  }
  0x54   :  { %579 = vrot.lane.b32.xlu0 %v578_v35, %s1776_s22  ;;  %v599_v41 = vsel %vm53_vm5, %v598_v15, %v597_v36  ;;  %v645_v42 = vsel %vm48_vm3, %v644_v25, %v643_v37  ;;  %v664_v43 = vsel %vm43_vm1, %v663_v32, %v655_v27  ;;  %v669_v44 = vrot.slane %v658_v28, 5  ;;  %v743_v16 = vld [vmem:[#allocation4 + $0x4f] sm:$0x1]  ;;  %v746_v17 = vld [vmem:[#allocation4 + $0x7f] sm:$0x1]  ;;  %s1794_s13 = smov 120  }
  0x55   :  { %v600_v48 = vsel %vm55_vm6, %v598_v15, %v599_v41  ;;  %v646_v49 = vsel %vm50_vm4, %v644_v25, %v645_v42  ;;  %v665_v50 = vsel %vm45_vm2, %v663_v32, %v664_v43  ;;  %v685_v51 = vrot.slane %v678_v34, 7  ;;  %v830_v41 = vld [vmem:[#allocation2 + $0x18] sm:$0xf]  ;;  %s1795_s14 = smov 118   ;;  %s1796_s15 = smov 104  }
  0x56   :  { %601 = vrot.lane.b32.xlu1 %v600_v48, %s1777_s23  ;;  %v648_v53 = vsel %vm53_vm5, %v647_v26, %v646_v49  ;;  %v667_v54 = vsel %vm48_vm3, %v666_v38, %v665_v50  ;;  %v688_v55 = vrot.slane %v679_v39, 6  ;;  %v691_v56 = vrot.slane %v680_v40, 5  ;;  %v919_v40 = vld [vmem:[#allocation2 + $0x18] sm:$0xf]  ;;  %s1797_s16 = smov 116   ;;  %s1798_s17 = smov 102  }
  0x57   :  { %v649_v59 = vsel %vm55_vm6, %v647_v26, %v648_v53  ;;  %v668_v60 = vsel %vm50_vm4, %v666_v38, %v667_v54  ;;  %v686_v61 = vsel %vm43_vm1, %v685_v51, %v677_v33  ;;  %v707_v62 = vrot.slane %v700_v46, 7  ;;  %v1691_v38 = vld [vmem:[#allocation2 + $0x18] ss:$0 sps:$4 sm:$0xff]   ;;  %s1799_s18 = smov 106   ;;  %s1800_s19 = smov 100  }
  0x58   :  { %650 = vrot.lane.b32.xlu0 %v649_v59, %s1778_s24  ;;  %v670_v2 = vsel %vm53_vm5, %v669_v44, %v668_v60  ;;  %v687_v3 = vsel %vm45_vm2, %v685_v51, %v686_v61  ;;  %v710_v4 = vrot.slane %v701_v47, 6  ;;  %v713_v5 = vrot.slane %v702_v52, 5  ;;  %v1690_v42 = vld [vmem:[#allocation2 + $0x18] ss:$0 sps:$4 sm:$0xff]   ;;  %s1801_s20 = smov 58   ;;  %s1802_s21 = smov 54  }
  0x59   :  { %v671_v7 = vsel %vm55_vm6, %v669_v44, %v670_v2  ;;  %v689_v8 = vsel %vm48_vm3, %v688_v55, %v687_v3  ;;  %v708_v9 = vsel %vm43_vm1, %v707_v62, %v699_v45  ;;  %v729_v10 = vrot.slane %v722_v58, 7  ;;  %v1693_v43 = vld [vmem:[#allocation2 + $0x18] ss:$0 sps:$4 sm:$0xff]   ;;  %s1803_s22 = smov 60   ;;  %s1804_s23 = smov 56  }
  0x5a   :  { %672 = vrot.lane.b32.xlu1 %v671_v7, %s1779_s25  ;;  %v690_v12 = vsel %vm50_vm4, %v688_v55, %v689_v8  ;;  %v709_v13 = vsel %vm45_vm2, %v707_v62, %v708_v9  ;;  %v732_v14 = vrot.slane %v723_v63, 6  ;;  %v735_v15 = vrot.slane %v724_v1, 5  ;;  %v1008_v44 = vld [vmem:[#allocation2 + $0x18] sm:$0xf]  ;;  %s1805_s24 = smov 98   ;;  %s1806_s25 = smov 42  }
  0x5b   :  { %v692_v18 = vsel %vm53_vm5, %v691_v56, %v690_v12  ;;  %v711_v19 = vsel %vm48_vm3, %v710_v4, %v709_v13  ;;  %v730_v20 = vsel %vm43_vm1, %v729_v10, %v721_v57  ;;  %v751_v21 = vrot.slane %v744_v6, 7  ;;  %v1692_v45 = vld [vmem:[#allocation2 + $0x18] ss:$0 sps:$4 sm:$0xff]  }
  0x5c   :  { %v693_v22 = vsel %vm55_vm6, %v691_v56, %v692_v18  ;;  %v712_v23 = vsel %vm50_vm4, %v710_v4, %v711_v19  ;;  %v731_v24 = vsel %vm45_vm2, %v729_v10, %v730_v20  ;;  %v754_v25 = vrot.slane %v745_v11, 6 }
  0x5d   :  { %694 = vrot.lane.b32.xlu0 %v693_v22, %s1780_s0  ;;  %v714_v26 = vsel %vm53_vm5, %v713_v5, %v712_v23  ;;  %v733_v27 = vsel %vm48_vm3, %v732_v14, %v731_v24  ;;  %v752_v28 = vsel %vm43_vm1, %v751_v21, %v743_v16  ;;  %v757_v29 = vrot.slane %v746_v17, 5  ;;  %s1807_s0 = smov 44  }
  0x5e   :  { %v715_v30 = vsel %vm55_vm6, %v713_v5, %v714_v26  ;;  %v734_v31 = vsel %vm50_vm4, %v732_v14, %v733_v27  ;;  %v753_v32 = vsel %vm45_vm2, %v751_v21, %v752_v28  ;;  %vm60_vm7 = vcmask 281752  }
  0x5f   :  { %716 = vrot.lane.b32.xlu1 %v715_v30, %s1781_s26  ;;  %v736_v33 = vsel %vm53_vm5, %v735_v15, %v734_v31  ;;  %v755_v34 = vsel %vm48_vm3, %v754_v25, %v753_v32  ;;  %vm82_vm8 = vcmask 429352   ;;  %vm104_vm9 = vcmask 576952   ;;  %v1097_v32 = vld [vmem:[#allocation2 + $0x18] sm:$0xf]  ;;  %s1808_s26 = smov 40  }
  0x60   :  { %v737_v35 = vsel %vm55_vm6, %v735_v15, %v736_v33  ;;  %v756_v36 = vsel %vm50_vm4, %v754_v25, %v755_v34  ;;  %vm126_vm10 = vcmask 724552   ;;  %vm148_vm11 = vcmask 872152  }
  0x61   :  { %738 = vrot.lane.b32.xlu0 %v737_v35, %s1782_s27  ;;  %v758_v37 = vsel %vm53_vm5, %v757_v29, %v756_v36  ;;  %vm195_vm12 = vcmask 1044472   ;;  %vm196_vm13 = vcmask 121860   ;;  %vm192_vm14 = vcmask 1039360   ;;  %s1809_s27 = smov 52  }
  0x62   :  { %v759_v39 = vsel %vm55_vm6, %v757_v29, %v758_v37  ;;  %vm170_vm15 = vcmask 1019752   ;;  %vm197_vm0 = vmor %vm196_vm13, %vm195_vm12  ;;  %vm219_vm1 = vcmask 265352   ;;  %vm241_vm2 = vcmask 412952   ;;  %v1170_v37 = vld [vmem:[%s2285_s2] sm:$0xff]  ;;  %s1818_s2 = smov [#allocation7]  }
  0x63   :  { %760 = vrot.lane.b32.xlu1 %v759_v39, %s1783_s28  ;;  %vm263_vm3 = vcmask 560552   ;;  %vm285_vm4 = vcmask 708152   ;;  %vm354_vm5 = vcmask 1044456   ;;  %vm355_vm6 = vcmask 105476   ;;  %s1810_s28 = smov 48  }
  0x64   :  { %vm400_vm12 = vcmask 396552   ;;  %vm467_vm13 = vcmask 1006592   ;;  %v1789_v34 = vmov 0  }
  0x65   :  { %807 = vrot.lane.b32.xlu0 %v1691_v38, %s1757_s30 }
  0x66   :  { %1689 = vset.pattern.permute.xlu0 %v1789_v34 }
  0x67   :  { %939 = vrot.lane.b32.xlu1 %v919_v40, %s1759_s5 }
  0x69   :  { %850 = vrot.lane.b32.xlu0 %v830_v41, %s1784_s4 }
  0x6b   :  { %984 = vrot.lane.b32.xlu1 %v1690_v42, %s1785_s6 }
  0x6d   :  { %895 = vrot.lane.b32.xlu0 %v1693_v43, %s1786_s7 }
  0x6f   :  { %1028 = vrot.lane.b32.xlu1 %v1008_v44, %s1787_s8 }
  0x73   :  { %1073 = vrot.lane.b32.xlu1 %v1692_v45, %s1756_s29 }
  0x90   :  { %v102_v46 = vpop.permute.xlu1 %101 }
  0x92   :  { %v58_v47 = vpop.permute.xlu0 %57 }
  0x93   :  { %61 = vst.msk [vmem:[#allocation2] sm:$0xf] %vm60_vm7, %v58_v47  ;;  %vm307_vm7 = vcmask 855752  }
  0x94   :  { %v124_v48 = vpop.permute.xlu1 %123 }
  0x96   :  { %v80_v49 = vpop.permute.xlu0 %79 }
  0x97   :  { %83 = vst.msk [vmem:[#allocation2] sm:$0xf] %vm82_vm8, %v80_v49  ;;  %vm351_vm8 = vcmask 1022976  }
  0x98   :  { %105 = vst.msk [vmem:[#allocation2] sm:$0xf] %vm104_vm9, %v102_v46  ;;  %vm329_vm9 = vcmask 1003352  }
  0x99   :  { %v146_v50 = vpop.permute.xlu1 %145  ;;  %127 = vst.msk [vmem:[#allocation2] sm:$0xf] %vm126_vm10, %v124_v48  ;;  %vm356_vm10 = vmor %vm355_vm6, %vm354_vm5  ;;  %vm516_vm5 = vcmask 380152   ;;  %vm538_vm6 = vcmask 527752  }
  0x9a   :  { %149 = vst.msk [vmem:[#allocation2] sm:$0xf] %vm148_vm11, %v146_v50  ;;  %vm378_vm11 = vcmask 248952  }
  0x9b   :  { %v190_v51 = vpop.permute.xlu0 %189 }
  0x9c   :  { %v191_v52 = vrot.slane %v190_v51, 4 }
  0x9d   :  { %v217_v53 = vpop.permute.xlu1 %216 }
  0x9e   :  { %v193_v55 = vsel %vm192_vm14, %v191_v52, %v190_v51 }
  0x9f   :  { %v168_v54 = vpop.permute.xlu0 %167 }
  0xa0   :  { %171 = vst.msk [vmem:[#allocation2] sm:$0xf] %vm170_vm15, %v168_v54  ;;  %vm423_vm15 = vcmask 839352  }
  0xa1   :  { %198 = vst.msk [vmem:[#allocation2] sm:$0xff] %vm197_vm0, %v193_v55  ;;  %vm470_vm0 = vcmask 1044440  }
  0xa2   :  { %v261_v56 = vpop.permute.xlu1 %260  ;;  %220 = vst.msk [vmem:[#allocation2 + $0x4] sm:$0xf] %vm219_vm1, %v217_v53  ;;  %vm471_vm1 = vcmask 89092  }
  0xa4   :  { %v239_v57 = vpop.permute.xlu0 %238 }
  0xa5   :  { %242 = vst.msk [vmem:[#allocation2 + $0x4] sm:$0xf] %vm241_vm2, %v239_v57  ;;  %vm445_vm2 = vcmask 986952  }
  0xa6   :  { %264 = vst.msk [vmem:[#allocation2 + $0x4] sm:$0xf] %vm263_vm3, %v261_v56  ;;  %v349_v58 = vpop.permute.xlu1 %348  ;;  %vm472_vm3 = vmor %vm471_vm1, %vm470_vm0  ;;  %vm675_vm0 = vcmask 363752   ;;  %vm697_vm1 = vcmask 511352  }
  0xa7   :  { %v350_v60 = vrot.slane %v349_v58, 4 }
  0xa8   :  { %v283_v59 = vpop.permute.xlu0 %282 }
  0xa9   :  { %286 = vst.msk [vmem:[#allocation2 + $0x4] sm:$0xf] %vm285_vm4, %v283_v59  ;;  %v352_v63 = vsel %vm351_vm8, %v350_v60, %v349_v58  ;;  %vm494_vm4 = vcmask 232552   ;;  %vm626_vm8 = vcmask 990208  }
  0xac   :  { %v305_v61 = vpop.permute.xlu0 %304 }
  0xad   :  { %308 = vst.msk [vmem:[#allocation2 + $0x4] sm:$0xf] %vm307_vm7, %v305_v61  ;;  %v327_v62 = vpop.permute.xlu1 %326  ;;  %vm560_vm7 = vcmask 675352  }
  0xae   :  { %330 = vst.msk [vmem:[#allocation2 + $0x4] sm:$0xf] %vm329_vm9, %v327_v62  ;;  %vm582_vm9 = vcmask 822952  }
  0xaf   :  { %357 = vst.msk [vmem:[#allocation2 + $0x4] sm:$0xff] %vm356_vm10, %v352_v63  ;;  %vm629_vm10 = vcmask 1044424  }
  0xb0   :  { %v376_v1 = vpop.permute.xlu0 %375 }
  0xb1   :  { %379 = vst.msk [vmem:[#allocation2 + $0x8] sm:$0xf] %vm378_vm11, %v376_v1  ;;  %v398_v2 = vpop.permute.xlu1 %397  ;;  %vm630_vm11 = vcmask 72708  }
  0xb2   :  { %401 = vst.msk [vmem:[#allocation2 + $0x8] sm:$0xf] %vm400_vm12, %v398_v2  ;;  %vm604_vm12 = vcmask 970552  }
  0xb4   :  { %v465_v3 = vpop.permute.xlu0 %464 }
  0xb5   :  { %v466_v4 = vrot.slane %v465_v3, 4 }
  0xb6   :  { %v421_v5 = vpop.permute.xlu1 %420  ;;  %v827_v6 = vld [vmem:[#allocation2] sm:$0xff] }
  0xb7   :  { %v468_v7 = vsel %vm467_vm13, %v466_v4, %v465_v3  ;;  %424 = vst.msk [vmem:[#allocation2 + $0x8] sm:$0xf] %vm423_vm15, %v421_v5  ;;  %838 = vrot.lane.b32.xlu1 %v827_v6, %s1784_s4  ;;  %v2063_v8 = vcombine.high %v827_v6, %v827_v6  ;;  %797 = vrot.lane.b32.xlu0 %v827_v6, %s1757_s30  ;;  %777 = vst [vmem:[#allocation3] sm:$0xf] %v827_v6  ;;  %vm653_vm15 = vcmask 216152  }
  0xb8   :  { %v443_v9 = vpop.permute.xlu0 %442  ;;  %v791_v13 = vcombine.low %v827_v6, %v827_v6  ;;  %vm631_vm13 = vmor %vm630_vm11, %vm629_vm10  ;;  %vm1030_vm10 = vcmask 752640   ;;  %vm1119_vm11 = vcmask 736256  }
  0xb9   :  { %446 = vst.msk [vmem:[#allocation2 + $0x8] sm:$0xf] %vm445_vm2, %v443_v9  ;;  %778 = vst [vmem:[#allocation3 + $0x8] sm:$0xf] %v2063_v8  ;;  %vm719_vm2 = vcmask 658952  }
  0xba   :  { %473 = vst.msk [vmem:[#allocation2 + $0x8] sm:$0xff] %vm472_vm3, %v468_v7  ;;  %v492_v10 = vpop.permute.xlu1 %491  ;;  %vm741_vm3 = vcmask 806552  }
  0xbb   :  { %495 = vst.msk [vmem:[#allocation2 + $0xc] sm:$0xf] %vm494_vm4, %v492_v10  ;;  %974 = vrot.lane.b32.xlu1 %v827_v6, %s1785_s6  ;;  %885 = vrot.lane.b32.xlu0 %v827_v6, %s1786_s7  ;;  %vm763_vm4 = vcmask 954152  }
  0xbd   :  { %v514_v11 = vpop.permute.xlu0 %513 }
  0xbe   :  { %517 = vst.msk [vmem:[#allocation2 + $0xc] sm:$0xf] %vm516_vm5, %v514_v11  ;;  %vm852_vm5 = vcmask 1031168  }
  0xbf   :  { %v536_v12 = vpop.permute.xlu1 %535  ;;  %1063 = vrot.lane.b32.xlu1 %v827_v6, %s1756_s29  ;;  %840 = vrot.lane.b32.xlu0 %v2063_v8, %s1784_s4 }
  0xc0   :  { %539 = vst.msk [vmem:[#allocation2 + $0xc] sm:$0xf] %vm538_vm6, %v536_v12  ;;  %vm897_vm6 = vcmask 900096  }
  0xc1   :  { %v558_v14 = vpop.permute.xlu0 %557 }
  0xc2   :  { %561 = vst.msk [vmem:[#allocation2 + $0xc] sm:$0xf] %vm560_vm7, %v558_v14  ;;  %vm986_vm7 = vcmask 883712  }
  0xc3   :  { %v624_v15 = vpop.permute.xlu1 %623  ;;  %927 = vrot.lane.b32.xlu1 %v827_v6, %s1759_s5  ;;  %795 = vrot.lane.b32.xlu0 %v791_v13, %s1757_s30 }
  0xc4   :  { %v625_v16 = vrot.slane %v624_v15, 4 }
  0xc6   :  { %v580_v17 = vpop.permute.xlu0 %579  ;;  %v627_v18 = vsel %vm626_vm8, %v625_v16, %v624_v15  ;;  %vm941_vm8 = vcmask 891904  }
  0xc7   :  { %583 = vst.msk [vmem:[#allocation2 + $0xc] sm:$0xf] %vm582_vm9, %v580_v17  ;;  %1016 = vrot.lane.b32.xlu1 %v827_v6, %s1787_s8  ;;  %883 = vrot.lane.b32.xlu0 %v791_v13, %s1786_s7  ;;  %vm1075_vm9 = vcmask 744448  }
  0xc8   :  { %v602_v19 = vpop.permute.xlu1 %601 }
  0xc9   :  { %605 = vst.msk [vmem:[#allocation2 + $0xc] sm:$0xf] %vm604_vm12, %v602_v19  ;;  %vm1180_vm12 = vcmask 1043456  }
  0xca   :  { %632 = vst.msk [vmem:[#allocation2 + $0xc] sm:$0xff] %vm631_vm13, %v627_v18  ;;  %v651_v20 = vpop.permute.xlu0 %650  ;;  %vm1176_vm13 = vcmask 293888  }
  0xcb   :  { %1105 = vrot.lane.b32.xlu1 %v827_v6, %s1788_s9  ;;  %972 = vrot.lane.b32.xlu0 %v791_v13, %s1785_s6  ;;  %654 = vst.msk [vmem:[#allocation2 + $0x10] sm:$0xf] %vm653_vm15, %v651_v20  ;;  %vm1417_vm15 = vcmask 261248  }
  0xcc   :  { %v673_v21 = vpop.permute.xlu1 %672 }
  0xcd   :  { %676 = vst.msk [vmem:[#allocation2 + $0x10] sm:$0xf] %vm675_vm0, %v673_v21  ;;  %vm1422_vm0 = vcmask 392448  }
  0xcf   :  { %929 = vrot.lane.b32.xlu1 %v2063_v8, %s1759_s5  ;;  %1061 = vrot.lane.b32.xlu0 %v791_v13, %s1756_s29  ;;  %v695_v22 = vpop.permute.xlu0 %694 }
  0xd0   :  { %698 = vst.msk [vmem:[#allocation2 + $0x10] sm:$0xf] %vm697_vm1, %v695_v22  ;;  %vm1427_vm1 = vcmask 523648  }
  0xd1   :  { %v917_v23 = vld [vmem:[#allocation2 + $0x8] sm:$0xff]  ;;  %v717_v24 = vpop.permute.xlu1 %716 }
  0xd2   :  { %v925_v25 = vcombine.high %v917_v23, %v917_v23  ;;  %720 = vst.msk [vmem:[#allocation2 + $0x10] sm:$0xf] %vm719_vm2, %v717_v24  ;;  %779 = vst [vmem:[#allocation3 + $0x10] sm:$0xf] %v917_v23  ;;  %v969_v30 = vcombine.low %v917_v23, %v917_v23  ;;  %vm1432_vm2 = vcmask 654848  }
  0xd3   :  { %1018 = vrot.lane.b32.xlu1 %v2063_v8, %s1787_s8  ;;  %931 = vrot.lane.b32.xlu0 %v917_v23, %s1759_s5  ;;  %v739_v26 = vpop.permute.xlu0 %738 }
  0xd4   :  { %742 = vst.msk [vmem:[#allocation2 + $0x10] sm:$0xf] %vm741_vm3, %v739_v26  ;;  %780 = vst [vmem:[#allocation3 + $0x18] sm:$0xf] %v925_v25  ;;  %vm1437_vm3 = vcmask 786048  }
  0xd5   :  { %v761_v27 = vpop.permute.xlu1 %760 }
  0xd6   :  { %764 = vst.msk [vmem:[#allocation2 + $0x10] sm:$0xf] %vm763_vm4, %v761_v27  ;;  %vm1442_vm4 = vcmask 917248  }
  0xd7   :  { %1107 = vrot.lane.b32.xlu1 %v2063_v8, %s1788_s9  ;;  %1020 = vrot.lane.b32.xlu0 %v917_v23, %s1787_s8  ;;  %v2122_v36 = vpop.permute.xlu0 %807 }
  0xd9   :  { %v2115_v33 = vpop.permute.xlu1 %939 }
  0xdb   :  { %1109 = vrot.lane.b32.xlu0 %v917_v23, %s1788_s9  ;;  %842 = vrot.lane.b32.xlu1 %v917_v23, %s1784_s4  ;;  %v2129_v39 = vpop.permute.xlu0 %850 }
  0xdd   :  { %v767_v28 = vld [vmem:[#allocation2 + $0x10] sm:$0xff]  ;;  %v2120_v35 = vpop.permute.xlu1 %984 }
  0xde   :  { %v773_v29 = vcombine.high %v767_v28, %v767_v28  ;;  %781 = vst [vmem:[#allocation3 + $0x20] sm:$0xf] %v767_v28  ;;  %v793_v31 = vcombine.low %v767_v28, %v767_v28 }
  0xdf   :  { %978 = vrot.lane.b32.xlu0 %v917_v23, %s1785_s6  ;;  %801 = vrot.lane.b32.xlu1 %v917_v23, %s1757_s30  ;;  %v2133_v41 = vpop.permute.xlu0 %895 }
  0xe0   :  { %782 = vst [vmem:[#allocation3 + $0x28] sm:$0xf] %v773_v29 }
  0xe1   :  { %v2127_v38 = vpop.permute.xlu1 %1028 }
  0xe3   :  { %1067 = vrot.lane.b32.xlu0 %v917_v23, %s1756_s29  ;;  %889 = vrot.lane.b32.xlu1 %v917_v23, %s1786_s7 }
  0xe5   :  { %v2131_v40 = vpop.permute.xlu1 %1073 }
  0xe7   :  { %976 = vrot.lane.b32.xlu0 %v969_v30, %s1785_s6  ;;  %799 = vrot.lane.b32.xlu1 %v969_v30, %s1757_s30 }
  0xeb   :  { %1065 = vrot.lane.b32.xlu0 %v969_v30, %s1756_s29  ;;  %887 = vrot.lane.b32.xlu1 %v969_v30, %s1786_s7 }
  0xef   :  { %933 = vrot.lane.b32.xlu0 %v925_v25, %s1759_s5  ;;  %844 = vrot.lane.b32.xlu1 %v925_v25, %s1784_s4 }
  0xf3   :  { %1022 = vrot.lane.b32.xlu0 %v925_v25, %s1787_s8  ;;  %805 = vrot.lane.b32.xlu1 %v767_v28, %s1757_s30 }
  0xf7   :  { %846 = vrot.lane.b32.xlu0 %v767_v28, %s1784_s4  ;;  %893 = vrot.lane.b32.xlu1 %v767_v28, %s1786_s7 }
  0xfb   :  { %982 = vrot.lane.b32.xlu0 %v767_v28, %s1785_s6  ;;  %935 = vrot.lane.b32.xlu1 %v767_v28, %s1759_s5 }
  0xff   :  { %1071 = vrot.lane.b32.xlu0 %v767_v28, %s1756_s29  ;;  %1024 = vrot.lane.b32.xlu1 %v767_v28, %s1787_s8 }
 0x103   :  { %848 = vrot.lane.b32.xlu1 %v773_v29, %s1784_s4  ;;  %803 = vrot.lane.b32.xlu0 %v793_v31, %s1757_s30  ;;  %s1817_s30 = smov 30  }
 0x107   :  { %980 = vrot.lane.b32.xlu1 %v793_v31, %s1785_s6  ;;  %891 = vrot.lane.b32.xlu0 %v793_v31, %s1786_s7 }
 0x10b   :  { %1069 = vrot.lane.b32.xlu1 %v793_v31, %s1756_s29  ;;  %937 = vrot.lane.b32.xlu0 %v773_v29, %s1759_s5  ;;  %s1816_s29 = smov 46   ;;  %s1571_s5 = sshll.u32 %s1818_s2, 4  ;;  %s1572_s5 = int_to_ptr.vmem [resolvable:$true] %s1571_s5 }
 0x10c   :  { %p1727_p9 = scmp.lt.s32.totalorder %s1572_s5, %s1572_s5 }
 0x10f   :  { %1113 = vrot.lane.b32.xlu1 %v767_v28, %s1788_s9  ;;  %1026 = vrot.lane.b32.xlu0 %v773_v29, %s1787_s8  ;;  %s1814_s8 = smov 32  }
 0x113   :  { %1111 = vrot.lane.b32.xlu0 %v925_v25, %s1788_s9  ;;  %1117 = vrot.lane.b32.xlu1 %v1097_v32, %s1788_s9 }
 0x117   :  { %1115 = vrot.lane.b32.xlu0 %v773_v29, %s1788_s9  ;;  %s1815_s9 = smov 34  }
 0x11b   :  { %1173 = vperm.xlu0 %1689, %v1170_v37  }
 0x129   :  { %v839_v42 = vpop.permute.xlu1 %838  ;;  %v798_v43 = vpop.permute.xlu0 %797 }
 0x12d   :  { %v975_v44 = vpop.permute.xlu1 %974  ;;  %v2135_v45 = vpop.permute.xlu0 %885 }
 0x131   :  { %v2137_v46 = vpop.permute.xlu1 %1063  ;;  %v841_v47 = vpop.permute.xlu0 %840 }
 0x132   :  { %v853_v48 = vsel %vm852_vm5, %v839_v42, %v841_v47 }
 0x133   :  { %865 = vst [vmem:[#allocation3 + $0x30] sm:$0xf] %v853_v48 }
 0x135   :  { %v928_v49 = vpop.permute.xlu1 %927  ;;  %v796_v50 = vpop.permute.xlu0 %795 }
 0x136   :  { %v809_v51 = vsel %vm192_vm14, %v796_v50, %v798_v43 }
 0x137   :  { %821 = vst [vmem:[#allocation3] sm:$0xf0] %v809_v51 }
 0x139   :  { %v1017_v52 = vpop.permute.xlu1 %1016  ;;  %v884_v53 = vpop.permute.xlu0 %883 }
 0x13a   :  { %v898_v54 = vsel %vm897_vm6, %v884_v53, %v2135_v45 }
 0x13b   :  { %910 = vst [vmem:[#allocation3 + $0x30] sm:$0xf0] %v898_v54 }
 0x13d   :  { %v1106_v55 = vpop.permute.xlu1 %1105  ;;  %v973_v56 = vpop.permute.xlu0 %972 }
 0x13e   :  { %v987_v57 = vsel %vm986_vm7, %v973_v56, %v975_v44 }
 0x13f   :  { %999 = vst [vmem:[#allocation3 + $0x60] sm:$0xf0] %v987_v57  ;;  %v1138_v57 = vld [vmem:[%s2284_s1] sm:$0xff]  ;;  %s1790_s1 = smov 122  }
 0x141   :  { %v930_v58 = vpop.permute.xlu1 %929  ;;  %v1062_v59 = vpop.permute.xlu0 %1061 }
 0x142   :  { %v942_v60 = vsel %vm941_vm8, %v928_v49, %v930_v58  ;;  %v1076_v61 = vsel %vm1075_vm9, %v1062_v59, %v2137_v46  ;;  %v1146_v34 = vld [vmem:[#allocation3 + $0x30] sm:$0xff] }
 0x143   :  { %954 = vst [vmem:[#allocation3 + $0x60] sm:$0xf] %v942_v60  ;;  %1088 = vst [vmem:[#allocation3 + $0x90] sm:$0xf0] %v1076_v61 }
 0x145   :  { %v1019_v62 = vpop.permute.xlu1 %1018  ;;  %v932_v63 = vpop.permute.xlu0 %931 }
 0x146   :  { %v1031_v1 = vsel %vm1030_vm10, %v1017_v52, %v1019_v62  ;;  %v943_v2 = vsel %vm941_vm8, %v930_v58, %v932_v63 }
 0x147   :  { %1043 = vst [vmem:[#allocation3 + $0x90] sm:$0xf] %v1031_v1  ;;  %955 = vst [vmem:[#allocation3 + $0x68] sm:$0xf] %v943_v2 }
 0x149   :  { %v1108_v3 = vpop.permute.xlu1 %1107  ;;  %v1021_v4 = vpop.permute.xlu0 %1020 }
 0x14a   :  { %v1120_v5 = vsel %vm1119_vm11, %v1106_v55, %v1108_v3  ;;  %v1032_v6 = vsel %vm1030_vm10, %v1019_v62, %v1021_v4  ;;  %v2193_v62 = vmul.f32 0.23570226, %v1138_v57 }
 0x14b   :  { %1132 = vst [vmem:[#allocation3 + $0xc0] sm:$0xf] %v1120_v5  ;;  %1044 = vst [vmem:[#allocation3 + $0x98] sm:$0xf] %v1032_v6 }
 0x14d   :  { %v2151_v7 = vpop.permute.xlu0 %1109  ;;  %v843_v8 = vpop.permute.xlu1 %842 }
 0x14e   :  { %v1121_v9 = vsel %vm1119_vm11, %v1108_v3, %v2151_v7  ;;  %v854_v10 = vsel %vm852_vm5, %v841_v47, %v843_v8  ;;  %v1140_v47 = vld [vmem:[#allocation3] sm:$0xff]  ;;  %v1158_v53 = vld [vmem:[#allocation3 + $0x90] sm:$0xff] }
 0x14f   :  { %1133 = vst [vmem:[#allocation3 + $0xc8] sm:$0xf] %v1121_v9  ;;  %866 = vst [vmem:[#allocation3 + $0x38] sm:$0xf] %v854_v10  ;;  %v1594_v48 = vpack.c.bf16 %v1146_v34, %v1140_v47 }
 0x151   :  { %v2156_v11 = vpop.permute.xlu0 %978  ;;  %v2158_v12 = vpop.permute.xlu1 %801 }
 0x152   :  { %v1164_v2 = vld [vmem:[#allocation3 + $0xc0] sm:$0xf] }
 0x155   :  { %v2160_v13 = vpop.permute.xlu0 %1067  ;;  %v2162_v14 = vpop.permute.xlu1 %889 }
 0x159   :  { %v977_v15 = vpop.permute.xlu0 %976  ;;  %v800_v16 = vpop.permute.xlu1 %799 }
 0x15a   :  { %v988_v17 = vsel %vm986_vm7, %v975_v44, %v977_v15  ;;  %v989_v18 = vsel %vm986_vm7, %v977_v15, %v2156_v11  ;;  %v810_v19 = vsel %vm192_vm14, %v798_v43, %v800_v16  ;;  %v811_v20 = vsel %vm192_vm14, %v800_v16, %v2158_v12 }
 0x15b   :  { %1000 = vst [vmem:[#allocation3 + $0x68] sm:$0xf0] %v988_v17  ;;  %1001 = vst [vmem:[#allocation3 + $0x70] sm:$0xf0] %v989_v18 }
 0x15c   :  { %822 = vst [vmem:[#allocation3 + $0x8] sm:$0xf0] %v810_v19  ;;  %823 = vst [vmem:[#allocation3 + $0x10] sm:$0xf0] %v811_v20 }
 0x15d   :  { %v1066_v21 = vpop.permute.xlu0 %1065  ;;  %v888_v22 = vpop.permute.xlu1 %887 }
 0x15e   :  { %v1077_v23 = vsel %vm1075_vm9, %v2137_v46, %v1066_v21  ;;  %v1078_v24 = vsel %vm1075_vm9, %v1066_v21, %v2160_v13  ;;  %v899_v25 = vsel %vm897_vm6, %v2135_v45, %v888_v22  ;;  %v900_v26 = vsel %vm897_vm6, %v888_v22, %v2162_v14 }
 0x15f   :  { %1089 = vst [vmem:[#allocation3 + $0x98] sm:$0xf0] %v1077_v23  ;;  %1090 = vst [vmem:[#allocation3 + $0xa0] sm:$0xf0] %v1078_v24 }
 0x160   :  { %911 = vst [vmem:[#allocation3 + $0x38] sm:$0xf0] %v899_v25  ;;  %912 = vst [vmem:[#allocation3 + $0x40] sm:$0xf0] %v900_v26 }
 0x161   :  { %v934_v27 = vpop.permute.xlu0 %933  ;;  %v845_v28 = vpop.permute.xlu1 %844 }
 0x162   :  { %v944_v29 = vsel %vm941_vm8, %v932_v63, %v934_v27  ;;  %v855_v30 = vsel %vm852_vm5, %v843_v8, %v845_v28  ;;  %v1153_v49 = vld [vmem:[#allocation3 + $0x68] sm:$0xff] }
 0x163   :  { %956 = vst [vmem:[#allocation3 + $0x70] sm:$0xf] %v944_v29  ;;  %867 = vst [vmem:[#allocation3 + $0x40] sm:$0xf] %v855_v30  ;;  %v1141_v43 = vld [vmem:[#allocation3 + $0x8] sm:$0xff]  ;;  %v1142_v34 = vld [vmem:[#allocation3 + $0x10] sm:$0xff] }
 0x165   :  { %v1023_v31 = vpop.permute.xlu0 %1022  ;;  %v806_v32 = vpop.permute.xlu1 %805 }
 0x166   :  { %v1033_v37 = vsel %vm1030_vm10, %v1021_v4, %v1023_v31  ;;  %v814_v42 = vsel %vm192_vm14, %v806_v32, %v2122_v36  ;;  %v1159_v45 = vld [vmem:[#allocation3 + $0x98] sm:$0xff]  ;;  %v1152_v36 = vld [vmem:[#allocation3 + $0x60] sm:$0xff] }
 0x167   :  { %v1147_v44 = vld [vmem:[#allocation3 + $0x38] sm:$0xff]  ;;  %1045 = vst [vmem:[#allocation3 + $0xa0] sm:$0xf] %v1033_v37  ;;  %826 = vst [vmem:[#allocation3 + $0x28] sm:$0xf0] %v814_v42  ;;  %v1596_v52 = vpack.c.bf16 %v1159_v45, %v1153_v49  ;;  %v1598_v56 = vpack.c.bf16 %v1158_v53, %v1152_v36 }
 0x168   :  { %v1592_v46 = vpack.c.bf16 %v1147_v44, %v1141_v43 }
 0x169   :  { %v847_v50 = vpop.permute.xlu0 %846  ;;  %v894_v51 = vpop.permute.xlu1 %893 }
 0x16a   :  { %1593 = vmatprep.subr.bf16.mxu0 %v1592_v46  ;;  %v856_v54 = vsel %vm852_vm5, %v845_v28, %v847_v50  ;;  %v903_v55 = vsel %vm897_vm6, %v894_v51, %v2133_v41  ;;  %v1165_v41 = vld [vmem:[#allocation3 + $0xc8] sm:$0xf]  ;;  %v1148_v26 = vld [vmem:[#allocation3 + $0x40] sm:$0xff]  ;;  %v1154_v49 = vld [vmem:[#allocation3 + $0x70] sm:$0xff] }
 0x16b   :  { %1595 = vmatpush1.bf16.msra.mxu0 %v1594_v48  ;;  %868 = vst [vmem:[#allocation3 + $0x48] sm:$0xf] %v856_v54  ;;  %915 = vst [vmem:[#allocation3 + $0x58] sm:$0xf0] %v903_v55  ;;  %v1602_v37 = vpack.c.bf16 %v1148_v26, %v1142_v34 }
 0x16c   :  { %1597 = vmatprep.subr.bf16.mxu0 %v1596_v52 }
 0x16d   :  { %v983_v58 = vpop.permute.xlu0 %982  ;;  %v936_v59 = vpop.permute.xlu1 %935 }
 0x16e   :  { %v992_v60 = vsel %vm986_vm7, %v983_v58, %v2120_v35  ;;  %v945_v61 = vsel %vm941_vm8, %v934_v27, %v936_v59  ;;  %v1145_v22 = vld [vmem:[#allocation3 + $0x28] sm:$0xff]  ;;  %v1160_v43 = vld [vmem:[#allocation3 + $0xa0] sm:$0xff] }
 0x16f   :  { %1599 = vmatpush1.bf16.msra.mxu0 %v1598_v56  ;;  %1004 = vst [vmem:[#allocation3 + $0x88] sm:$0xf0] %v992_v60  ;;  %957 = vst [vmem:[#allocation3 + $0x78] sm:$0xf] %v945_v61 }
 0x170   :  { %1583 = vmatprep.subr.msk.mxu0 %vm1180_vm12, %v1165_v41 }
 0x171   :  { %v1072_v63 = vpop.permute.xlu0 %1071  ;;  %v1025_v1 = vpop.permute.xlu1 %1024 }
 0x172   :  { %v1081_v3 = vsel %vm1075_vm9, %v1072_v63, %v2131_v40  ;;  %v1034_v4 = vsel %vm1030_vm10, %v1023_v31, %v1025_v1 }
 0x173   :  { %1584 = vmatpush1.msk.msra.mxu0 %vm1180_vm12, %v1164_v2  ;;  %1093 = vst [vmem:[#allocation3 + $0xb8] sm:$0xf0] %v1081_v3  ;;  %1046 = vst [vmem:[#allocation3 + $0xa8] sm:$0xf] %v1034_v4 }
 0x174   :  { %1585 = vmatmul.mubr.msk.f32.vlgmr.msra.gmra.mrb[0].mxu0 %vm1176_vm13, %v2193_v62 }
 0x175   :  { %1405 = vmatprep.mubr.f32.mxu0 %v1751_v0  ;;  %v849_v35 = vpop.permute.xlu1 %848  ;;  %v804_v5 = vpop.permute.xlu0 %803 }
 0x176   :  { %v857_v6 = vsel %vm852_vm5, %v847_v50, %v849_v35  ;;  %v858_v8 = vsel %vm852_vm5, %v849_v35, %v2129_v39  ;;  %v812_v40 = vsel %vm192_vm14, %v2158_v12, %v804_v5  ;;  %v813_v9 = vsel %vm192_vm14, %v804_v5, %v806_v32 }
 0x177   :  { %869 = vst [vmem:[#allocation3 + $0x50] sm:$0xf] %v857_v6  ;;  %870 = vst [vmem:[#allocation3 + $0x58] sm:$0xf] %v858_v8  ;;  %v1606_v50 = vpack.c.bf16 %v1160_v43, %v1154_v49  ;;  %vm1411_vm14 = vcmask 130048   ;;  %vm1449_vm5 = vcmask 932864  }
 0x178   :  { %824 = vst [vmem:[#allocation3 + $0x18] sm:$0xf0] %v812_v40  ;;  %825 = vst [vmem:[#allocation3 + $0x20] sm:$0xf0] %v813_v9 }
 0x179   :  { %v981_v10 = vpop.permute.xlu1 %980  ;;  %v892_v15 = vpop.permute.xlu0 %891 }
 0x17a   :  { %v990_v0 = vsel %vm986_vm7, %v2156_v11, %v981_v10  ;;  %v991_v16 = vsel %vm986_vm7, %v981_v10, %v983_v58  ;;  %v901_v17 = vsel %vm897_vm6, %v2162_v14, %v892_v15  ;;  %v902_v39 = vsel %vm897_vm6, %v892_v15, %v894_v51 }
 0x17b   :  { %1002 = vst [vmem:[#allocation3 + $0x78] sm:$0xf0] %v990_v0  ;;  %1003 = vst [vmem:[#allocation3 + $0x80] sm:$0xf0] %v991_v16  ;;  %vm1452_vm6 = vcmask 1048448   ;;  %vm1483_vm7 = vcmask 818176  }
 0x17c   :  { %913 = vst [vmem:[#allocation3 + $0x48] sm:$0xf0] %v901_v17  ;;  %914 = vst [vmem:[#allocation3 + $0x50] sm:$0xf0] %v902_v39 }
 0x17d   :  { %v1070_v12 = vpop.permute.xlu1 %1069  ;;  %v938_v18 = vpop.permute.xlu0 %937 }
 0x17e   :  { %v1079_v19 = vsel %vm1075_vm9, %v2160_v13, %v1070_v12  ;;  %v1080_v20 = vsel %vm1075_vm9, %v1070_v12, %v1072_v63  ;;  %v946_v11 = vsel %vm941_vm8, %v936_v59, %v938_v18  ;;  %v947_v21 = vsel %vm941_vm8, %v938_v18, %v2115_v33  ;;  %v1151_v14 = vld [vmem:[#allocation3 + $0x58] sm:$0xff] }
 0x17f   :  { %1091 = vst [vmem:[#allocation3 + $0xa8] sm:$0xf0] %v1079_v19  ;;  %1092 = vst [vmem:[#allocation3 + $0xb0] sm:$0xf0] %v1080_v20  ;;  %v1608_v23 = vpack.c.bf16 %v1151_v14, %v1145_v22  ;;  %v1143_v25 = vld [vmem:[#allocation3 + $0x18] sm:$0xff]  ;;  %v1144_v29 = vld [vmem:[#allocation3 + $0x20] sm:$0xff] }
 0x180   :  { %958 = vst [vmem:[#allocation3 + $0x80] sm:$0xf] %v946_v11  ;;  %959 = vst [vmem:[#allocation3 + $0x88] sm:$0xf] %v947_v21  ;;  %vm1509_vm8 = vcmask 441344   ;;  %vm1542_vm9 = vcmask 326656  }
 0x181   :  { %v1027_v24 = vpop.permute.xlu0 %1026  ;;  %1609 = vmatprep.subr.bf16.mxu0 %v1608_v23  ;;  %v1114_v33 = vpop.permute.xlu1 %1113 }
 0x182   :  { %v1035_v13 = vsel %vm1030_vm10, %v1025_v1, %v1027_v24  ;;  %v1036_v27 = vsel %vm1030_vm10, %v1027_v24, %v2127_v38  ;;  %v1155_v38 = vld [vmem:[#allocation3 + $0x78] sm:$0xff] }
 0x183   :  { %v1149_v28 = vld [vmem:[#allocation3 + $0x48] sm:$0xff]  ;;  %v1150_v30 = vld [vmem:[#allocation3 + $0x50] sm:$0xff]  ;;  %1047 = vst [vmem:[#allocation3 + $0xb0] sm:$0xf] %v1035_v13  ;;  %1048 = vst [vmem:[#allocation3 + $0xb8] sm:$0xf] %v1036_v27 }
 0x184   :  { %v1600_v31 = vpack.c.bf16 %v1149_v28, %v1143_v25  ;;  %v1610_v32 = vpack.c.bf16 %v1150_v30, %v1144_v29 }
 0x185   :  { %v1112_v42 = vpop.permute.xlu0 %1111  ;;  %v1118_v47 = vpop.permute.xlu1 %1117 }
 0x186   :  { %1601 = vmatprep.subr.bf16.mxu1 %v1600_v31  ;;  %1611 = vmatpush1.bf16.msra.mxu0 %v1610_v32  ;;  %v1122_v44 = vsel %vm1119_vm11, %v2151_v7, %v1112_v42  ;;  %v1123_v45 = vsel %vm1119_vm11, %v1112_v42, %v1114_v33  ;;  %v1161_v46 = vld [vmem:[#allocation3 + $0xa8] sm:$0xff] }
 0x187   :  { %1603 = vmatpush1.bf16.msra.mxu1 %v1602_v37  ;;  %1134 = vst [vmem:[#allocation3 + $0xd0] sm:$0xf] %v1122_v44  ;;  %1135 = vst [vmem:[#allocation3 + $0xd8] sm:$0xf] %v1123_v45  ;;  %v1604_v48 = vpack.c.bf16 %v1161_v46, %v1155_v38  ;;  %v1157_v52 = vld [vmem:[#allocation3 + $0x88] sm:$0xff]  ;;  %v1156_v55 = vld [vmem:[#allocation3 + $0x80] sm:$0xff] }
 0x189   :  { %1605 = vmatprep.subr.bf16.mxu1 %v1604_v48  ;;  %v1116_v51 = vpop.permute.xlu0 %1115 }
 0x18a   :  { %v1124_v53 = vsel %vm1119_vm11, %v1114_v33, %v1116_v51  ;;  %v1125_v54 = vsel %vm1119_vm11, %v1116_v51, %v1118_v47  ;;  %v1163_v7 = vld [vmem:[#allocation3 + $0xb8] sm:$0xff]  ;;  %v1162_v36 = vld [vmem:[#allocation3 + $0xb0] sm:$0xff] }
 0x18b   :  { %1607 = vmatpush1.bf16.msra.mxu1 %v1606_v50  ;;  %1136 = vst [vmem:[#allocation3 + $0xe0] sm:$0xf] %v1124_v53  ;;  %1137 = vst [vmem:[#allocation3 + $0xe8] sm:$0xf] %v1125_v54  ;;  %v1612_v56 = vpack.c.bf16 %v1163_v7, %v1157_v52  ;;  %v1614_v57 = vpack.c.bf16 %v1162_v36, %v1156_v55 }
 0x18d   :  { %1613 = vmatprep.subr.bf16.mxu0 %v1612_v56 }
 0x18e   :  { %1615 = vmatpush1.bf16.msra.mxu0 %v1614_v57  ;;  %v1167_v58 = vld [vmem:[#allocation3 + $0xd8] sm:$0xf]  ;;  %v1166_v59 = vld [vmem:[#allocation3 + $0xd0] sm:$0xf] }
 0x18f   :  { %1586 = vmatprep.subr.msk.mxu1 %vm1180_vm12, %v1167_v58 }
 0x190   :  { %1587 = vmatpush1.msk.msra.mxu1 %vm1180_vm12, %v1166_v59 }
 0x191   :  { %1588 = vmatmul.mubr.msk.f32.vlgmr.msra.gmra.mrb[0].mxu1 %vm1176_vm13, %v2193_v62 }
 0x192   :  { %v1169_v60 = vld [vmem:[#allocation3 + $0xe8] sm:$0xf]  ;;  %v1168_v61 = vld [vmem:[#allocation3 + $0xe0] sm:$0xf] }
 0x193   :  { %1589 = vmatprep.subr.msk.mxu0 %vm1180_vm12, %v1169_v60 }
 0x194   :  { %1590 = vmatpush1.msk.msra.mxu0 %vm1180_vm12, %v1168_v61 }
 0x195   :  { %1591 = vmatmul.mubr.msk.f32.vlgmr.msra.gmra.mrb[2].mxu0 %vm1176_vm13, %v2193_v62 }
 0x19a   :  { %v1174_v41 = vpop.permute.xlu0 %1173 }
 0x247   :  { %v1265_v63 = vpop.f32.mrb[0].mxu0 }
 0x248   :  { %v1266_v1 = vadd.f32 %v1265_v63, %v1174_v41  ;;  %v1267_v2 = vpop.f32.mrb[1].mxu0 }
 0x249   :  { %v1268_v3 = vadd.f32 %v1267_v2, %v1174_v41 }
 0x24a   :  { %1424 = vrot.lane.b32.xlu0 %v1266_v1, %s1790_s1  ;;  %1414 = vrot.lane.b32.xlu1 %v1266_v1, %s1784_s4  ;;  %1412 = vst.msk [vmem:[#allocation7] sm:$0xff] %vm1411_vm14, %v1266_v1  ;;  %s1811_s4 = smov 50   ;;  %s1722_s1 = scalar_lea.vmem %s1572_s5, 512 }
 0x24b   :  { %p1723_p8 = scmp.ne.s32.totalorder %s1572_s5, %s1722_s1  ;;  %p1728_p10 = scmp.lt.s32.totalorder %s1722_s1, %s1722_s1 }
 0x24d   :  { %p1729_p11 = por %p1728_p10, %p1727_p9 }
 0x24e   :  { %1445 = vrot.lane.b32.xlu0 %v1266_v1, %s1791_s10  ;;  %1419 = vrot.lane.b32.xlu1 %v1266_v1, %s1792_s11 }
 0x24f   :  { %p1730_p12 = pnand %p1729_p11, %p1723_p8 }
 0x252   :  { %1454 = vrot.lane.b32.xlu0 %v1268_v3, %s1793_s12  ;;  %1429 = vrot.lane.b32.xlu1 %v1266_v1, %s1794_s13 }
 0x256   :  { %1462 = vrot.lane.b32.xlu0 %v1268_v3, %s1785_s6  ;;  %1434 = vrot.lane.b32.xlu1 %v1266_v1, %s1795_s14  ;;  %s1812_s6 = smov 38  }
 0x25a   :  { %1470 = vrot.lane.b32.xlu0 %v1268_v3, %s1796_s15  ;;  %1439 = vrot.lane.b32.xlu1 %v1266_v1, %s1797_s16 }
 0x25e   :  { %1474 = vrot.lane.b32.xlu0 %v1268_v3, %s1798_s17  ;;  %1458 = vrot.lane.b32.xlu1 %v1268_v3, %s1786_s7  ;;  %s1813_s7 = smov 36  }
 0x262   :  { %1466 = vrot.lane.b32.xlu1 %v1268_v3, %s1799_s18 }
 0x264   :  { %v1336_v62 = vpop.f32.mrb[0].mxu1 }
 0x265   :  { %v1337_v4 = vadd.f32 %v1336_v62, %v1174_v41  ;;  %v1338_v35 = vpop.f32.mrb[1].mxu1 }
 0x266   :  { %1479 = vrot.lane.b32.xlu1 %v1268_v3, %s1800_s19  ;;  %v1339_v8 = vadd.f32 %v1338_v35, %v1174_v41 }
 0x267   :  { %1496 = vrot.lane.b32.xlu0 %v1337_v4, %s1801_s20 }
 0x268   :  { %v1407_v5 = vpop.f32.mrb[2].mxu0 }
 0x269   :  { %v1409_v6 = vpop.f32.mrb[3].mxu0  ;;  %v1408_v40 = vadd.f32 %v1407_v5, %v1174_v41 }
 0x26a   :  { %1447 = vrot.lane.b32.xlu1 %v1268_v3, %s1791_s10 }
 0x26b   :  { %1505 = vrot.lane.b32.xlu0 %v1337_v4, %s1802_s21 }
 0x26e   :  { %1491 = vrot.lane.b32.xlu1 %v1337_v4, %s1803_s22 }
 0x26f   :  { %1481 = vrot.lane.b32.xlu0 %v1337_v4, %s1800_s19 }
 0x272   :  { %1500 = vrot.lane.b32.xlu1 %v1337_v4, %s1804_s23 }
 0x273   :  { %1487 = vrot.lane.b32.xlu0 %v1337_v4, %s1805_s24 }
 0x276   :  { %1533 = vrot.lane.b32.xlu1 %v1339_v8, %s1806_s25 }
 0x277   :  { %1529 = vrot.lane.b32.xlu0 %v1339_v8, %s1807_s0 }
 0x27a   :  { %1507 = vrot.lane.b32.xlu1 %v1339_v8, %s1802_s21 }
 0x27b   :  { %1538 = vrot.lane.b32.xlu0 %v1339_v8, %s1808_s26 }
 0x27e   :  { %1513 = vrot.lane.b32.xlu1 %v1339_v8, %s1809_s27 }
 0x27f   :  { %1521 = vrot.lane.b32.xlu0 %v1339_v8, %s1810_s28 }
 0x282   :  { %1517 = vrot.lane.b32.xlu1 %v1339_v8, %s1811_s4 }
 0x283   :  { %1546 = vrot.lane.b32.xlu0 %v1408_v40, %s1812_s6 }
 0x286   :  { %1540 = vrot.lane.b32.xlu1 %v1408_v40, %s1808_s26 }
 0x287   :  { %1550 = vrot.lane.b32.xlu0 %v1408_v40, %s1813_s7 }
 0x28a   :  { %1558 = vrot.lane.b32.xlu1 %v1408_v40, %s1814_s8 }
 0x28b   :  { %1554 = vrot.lane.b32.xlu0 %v1408_v40, %s1815_s9 }
 0x28e   :  { %1525 = vrot.lane.b32.xlu1 %v1339_v8, %s1816_s29 }
 0x28f   :  { %1562 = vrot.lane.b32.xlu0 %v1408_v40, %s1817_s30 }
 0x2bc   :  { %v1425_v9 = vpop.permute.xlu0 %1424  ;;  %v1415_v10 = vpop.permute.xlu1 %1414 }
 0x2bd   :  { %1418 = vst.msk [vmem:[#allocation7] sm:$0xff] %vm1417_vm15, %v1415_v10 }
 0x2c0   :  { %v1446_v15 = vpop.permute.xlu0 %1445  ;;  %v1420_v0 = vpop.permute.xlu1 %1419 }
 0x2c1   :  { %1423 = vst.msk [vmem:[#allocation7] sm:$0xff] %vm1422_vm0, %v1420_v0 }
 0x2c2   :  { %1428 = vst.msk [vmem:[#allocation7] sm:$0xff] %vm1427_vm1, %v1425_v9 }
 0x2c4   :  { %v1455_v16 = vpop.permute.xlu0 %1454  ;;  %v1430_v17 = vpop.permute.xlu1 %1429 }
 0x2c5   :  { %1457 = vst.msk [vmem:[#allocation7 + $0x8] sm:$0xff] %vm1411_vm14, %v1455_v16 }
 0x2c6   :  { %1433 = vst.msk [vmem:[#allocation7] sm:$0xff] %vm1432_vm2, %v1430_v17 }
 0x2c8   :  { %v1435_v39 = vpop.permute.xlu1 %1434  ;;  %v1463_v12 = vpop.permute.xlu0 %1462 }
 0x2c9   :  { %1438 = vst.msk [vmem:[#allocation7] sm:$0xff] %vm1437_vm3, %v1435_v39 }
 0x2cc   :  { %v1440_v18 = vpop.permute.xlu1 %1439  ;;  %v1471_v19 = vpop.permute.xlu0 %1470 }
 0x2cd   :  { %1443 = vst.msk [vmem:[#allocation7] sm:$0xff] %vm1442_vm4, %v1440_v18 }
 0x2d0   :  { %v1459_v20 = vpop.permute.xlu1 %1458  ;;  %v1475_v21 = vpop.permute.xlu0 %1474 }
 0x2d1   :  { %1461 = vst.msk [vmem:[#allocation7 + $0x8] sm:$0xff] %vm1417_vm15, %v1459_v20 }
 0x2d2   :  { %1465 = vst.msk [vmem:[#allocation7 + $0x8] sm:$0xff] %vm1422_vm0, %v1463_v12 }
 0x2d4   :  { %v1467_v11 = vpop.permute.xlu1 %1466 }
 0x2d5   :  { %1469 = vst.msk [vmem:[#allocation7 + $0x8] sm:$0xff] %vm1427_vm1, %v1467_v11 }
 0x2d6   :  { %1473 = vst.msk [vmem:[#allocation7 + $0x8] sm:$0xff] %vm1432_vm2, %v1471_v19 }
 0x2d7   :  { %1477 = vst.msk [vmem:[#allocation7 + $0x8] sm:$0xff] %vm1437_vm3, %v1475_v21 }
 0x2d8   :  { %v1480_v22 = vpop.permute.xlu1 %1479 }
 0x2d9   :  { %v1497_v14 = vpop.permute.xlu0 %1496 }
 0x2dc   :  { %v1448_v23 = vpop.permute.xlu1 %1447 }
 0x2dd   :  { %v1450_v24 = vsel %vm1449_vm5, %v1446_v15, %v1448_v23  ;;  %v1506_v25 = vpop.permute.xlu0 %1505 }
 0x2de   :  { %1453 = vst.msk [vmem:[#allocation7] sm:$0xff] %vm1452_vm6, %v1450_v24 }
 0x2e0   :  { %v1492_v26 = vpop.permute.xlu1 %1491 }
 0x2e1   :  { %1495 = vst.msk [vmem:[#allocation7 + $0x10] sm:$0xff] %vm1411_vm14, %v1492_v26  ;;  %v1482_v13 = vpop.permute.xlu0 %1481 }
 0x2e2   :  { %1499 = vst.msk [vmem:[#allocation7 + $0x10] sm:$0xff] %vm1417_vm15, %v1497_v14  ;;  %v1484_v27 = vsel %vm1483_vm7, %v1480_v22, %v1482_v13 }
 0x2e3   :  { %1486 = vst.msk [vmem:[#allocation7 + $0x8] sm:$0xff] %vm1442_vm4, %v1484_v27 }
 0x2e4   :  { %v1501_v28 = vpop.permute.xlu1 %1500 }
 0x2e5   :  { %1503 = vst.msk [vmem:[#allocation7 + $0x10] sm:$0xff] %vm1422_vm0, %v1501_v28  ;;  %v1488_v29 = vpop.permute.xlu0 %1487 }
 0x2e6   :  { %1490 = vst.msk [vmem:[#allocation7 + $0x8] sm:$0xff] %vm1452_vm6, %v1488_v29 }
 0x2e8   :  { %v1534_v30 = vpop.permute.xlu1 %1533 }
 0x2e9   :  { %v1530_v33 = vpop.permute.xlu0 %1529 }
 0x2ea   :  { %1532 = vst.msk [vmem:[#allocation7 + $0x18] sm:$0xff] %vm1411_vm14, %v1530_v33 }
 0x2eb   :  { %1536 = vst.msk [vmem:[#allocation7 + $0x18] sm:$0xff] %vm1417_vm15, %v1534_v30 }
 0x2ec   :  { %v1508_v31 = vpop.permute.xlu1 %1507 }
 0x2ed   :  { %v1510_v32 = vsel %vm1509_vm8, %v1506_v25, %v1508_v31  ;;  %v1539_v34 = vpop.permute.xlu0 %1538 }
 0x2ee   :  { %1512 = vst.msk [vmem:[#allocation7 + $0x10] sm:$0xff] %vm1427_vm1, %v1510_v32 }
 0x2f0   :  { %v1514_v37 = vpop.permute.xlu1 %1513 }
 0x2f1   :  { %1516 = vst.msk [vmem:[#allocation7 + $0x10] sm:$0xff] %vm1432_vm2, %v1514_v37  ;;  %v1522_v42 = vpop.permute.xlu0 %1521 }
 0x2f4   :  { %v1518_v43 = vpop.permute.xlu1 %1517 }
 0x2f5   :  { %1520 = vst.msk [vmem:[#allocation7 + $0x10] sm:$0xff] %vm1437_vm3, %v1518_v43  ;;  %v1547_v44 = vpop.permute.xlu0 %1546 }
 0x2f6   :  { %1524 = vst.msk [vmem:[#allocation7 + $0x10] sm:$0xff] %vm1442_vm4, %v1522_v42 }
 0x2f8   :  { %v1541_v45 = vpop.permute.xlu1 %1540 }
 0x2f9   :  { %v1543_v38 = vsel %vm1542_vm9, %v1539_v34, %v1541_v45  ;;  %v1551_v46 = vpop.permute.xlu0 %1550 }
 0x2fa   :  { %1545 = vst.msk [vmem:[#allocation7 + $0x18] sm:$0xff] %vm1422_vm0, %v1543_v38 }
 0x2fb   :  { %1549 = vst.msk [vmem:[#allocation7 + $0x18] sm:$0xff] %vm1427_vm1, %v1547_v44 }
 0x2fc   :  { %1553 = vst.msk [vmem:[#allocation7 + $0x18] sm:$0xff] %vm1432_vm2, %v1551_v46  ;;  %v1559_v47 = vpop.permute.xlu1 %1558 }
 0x2fd   :  { %v1555_v48 = vpop.permute.xlu0 %1554 }
 0x2fe   :  { %1557 = vst.msk [vmem:[#allocation7 + $0x18] sm:$0xff] %vm1437_vm3, %v1555_v48 }
 0x2ff   :  { %1561 = vst.msk [vmem:[#allocation7 + $0x18] sm:$0xff] %vm1442_vm4, %v1559_v47 }
 0x300   :  { %v1526_v49 = vpop.permute.xlu1 %1525 }
 0x301   :  { %1528 = vst.msk [vmem:[#allocation7 + $0x10] sm:$0xff] %vm1452_vm6, %v1526_v49  ;;  %v1563_v50 = vpop.permute.xlu0 %1562 }
 0x302   :  { %1565 = vst.msk [vmem:[#allocation7 + $0x18] sm:$0xff] %vm1452_vm6, %v1563_v50 }
 0x303   :  { %1733 = shalt.err (!%p1730_p12)
}
 0x304   :  { %s1734_s12 = scalar_lea.hbm %s2286_s3, 512 }
 0x305   :  { %p1735_p13 = scmp.ne.s32.totalorder %s2286_s3, %s1734_s12  ;;  %p1738_p0 = scmp.lt.u32.totalorder %s1734_s12, %s2286_s3 }
 0x307   :  { %p1740_p1 = pnand %p1738_p0, %p1735_p13 }
 0x309   :  { %1743 = shalt.err (!%p1740_p1)
}
 0x30a   :  { %s1819_s17 = smov 256   ;;  %s1820_s18 = smov 16  }
 0x30b   :  { %1577 = dma.vmem_to_hbm [thread:$0]  %s1572_s5, 512, %s2286_s3, [#allocation6], %s1819_s17, %s1819_s17, %s1820_s18  }
 0x30c   :  { %1746 = dma.done.wait [#allocation6], 512  }
 0x30d   :  { %1747 = vsyncadd [#allocation6], 4294966784 }
 0x30e   :  { %1581 = vsyncpa [#allocation5], 1 }
 0x30f   :  { %1582 = vsyncpa [#allocation6], 1 }

</bundles_post_ra>
